<compile_context>
chip_gen: v7x
topology: tpu7x:2x2x1
jax: 0.10.0
libtpu: 0.0.40
codegen_flags: <defaults>
</compile_context>

<pallas_src>
import functools

import jax
import jax.numpy as jnp
from jax import lax
from jax.experimental import pallas as pl
from jax.experimental.pallas import tpu as pltpu

INPUT_SIZE = 10
HIDDEN_SIZE = 20
NUM_LAYERS = 2


def _blstm_kernel(x_ref, wih0_ref, whh0_ref, b0_ref,
                  wih1_ref, whh1_ref, b1_ref,
                  out_ref, hn_ref, cn_ref,
                  g_sc, h1_sc,
                  *, seq_len, batch_p, hidden):
    """Fused 2-layer LSTM. Single invocation (no grid); time loop in-kernel."""
    T, Bp, H = seq_len, batch_p, hidden

    def run_layer(layer, xin_ref, wih_ref, whh_ref, b_ref, h_out_ref):
        # Hoisted input-to-hidden matmul for ALL time steps at once:
        # (T*Bp, D_in) @ (D_in, 4H) + bias  ->  VMEM scratch.
        g_sc[...] = (
            jnp.dot(xin_ref[...], wih_ref[...],
                    preferred_element_type=jnp.float32)
            + b_ref[...])

        whh = whh_ref[...]  # (H, 4H), loaded once per layer

        def step(t, carry):
            h, c = carry
            row = pl.multiple_of(t * Bp, Bp)  # sublane-aligned offset
            gates = (g_sc[pl.ds(row, Bp), :]
                     + jnp.dot(h, whh, preferred_element_type=jnp.float32))
            # Gate order pre-permuted in the wrapper to [i, f, o, g]:
            # one sigmoid over the first 3H lanes, one tanh over the last H.
            sig = jax.nn.sigmoid(gates[:, :3 * H])
            i_g = sig[:, 0 * H:1 * H]
            f_g = sig[:, 1 * H:2 * H]
            o_g = sig[:, 2 * H:3 * H]
            g_g = jnp.tanh(gates[:, 3 * H:])
            c_new = f_g * c + i_g * g_g
            h_new = o_g * jnp.tanh(c_new)
            h_out_ref[pl.ds(row, Bp), :] = h_new
            return h_new, c_new

        zero = jnp.zeros((Bp, H), jnp.float32)
        h_fin, c_fin = lax.fori_loop(0, T, step, (zero, zero), unroll=True)
        # Final states written exactly once per layer.
        hn_ref[layer] = h_fin
        cn_ref[layer] = c_fin

    # Layer 0: reads x, writes hidden sequence into VMEM scratch h1_sc.
    run_layer(0, x_ref, wih0_ref, whh0_ref, b0_ref, h1_sc)
    # Layer 1: reads h1_sc straight from VMEM, writes the kernel output.
    run_layer(1, h1_sc, wih1_ref, whh1_ref, b1_ref, out_ref)


def _blstm_pallas(x, kparams):
    """x: (T, B, D_in); kparams: [(w_ih (D,4H), w_hh (H,4H), b (1,4H))] * 2."""
    T, B, D_in = x.shape
    H = kparams[0][1].shape[0]
    Bp = ((B + 7) // 8) * 8  # pad batch to a full sublane group

    x_p = jnp.pad(x, ((0, 0), (0, Bp - B), (0, 0)))
    x_flat = x_p.reshape(T * Bp, D_in)

    (wih0, whh0, b0), (wih1, whh1, b1) = kparams

    kernel = functools.partial(_blstm_kernel,
                               seq_len=T, batch_p=Bp, hidden=H)

    vmem = pl.BlockSpec(memory_space=pltpu.MemorySpace.VMEM)
    out_flat, hn_p, cn_p = pl.pallas_call(
        kernel,
        out_shape=(
            jax.ShapeDtypeStruct((T * Bp, H), jnp.float32),       # output seq
            jax.ShapeDtypeStruct((NUM_LAYERS, Bp, H), jnp.float32),  # h_n
            jax.ShapeDtypeStruct((NUM_LAYERS, Bp, H), jnp.float32),  # c_n
        ),
        in_specs=[vmem] * 7,
        out_specs=(vmem, vmem, vmem),
        scratch_shapes=[
            pltpu.VMEM((T * Bp, 4 * H), jnp.float32),  # hoisted input gates
            pltpu.VMEM((T * Bp, H), jnp.float32),      # layer-1 activations
        ],
    )(x_flat, wih0, whh0, b0, wih1, whh1, b1)

    out = out_flat.reshape(T, Bp, H)[:, :B, :]
    h_n = hn_p[:, :B, :]
    c_n = cn_p[:, :B, :]
    return out, (h_n, c_n)


@jax.jit
def blstm_forward(x, torch_params):
    """Equivalent of BLSTM.forward: returns (output, (h_n, c_n)).

    torch_params: per layer (weight_ih (4H,D_in), weight_hh (4H,H),
                             bias_ih (4H,), bias_hh (4H,)) in PyTorch layout,
    gate order [i, f, g, o]. Weights are transposed, biases summed, and gate
    blocks permuted to [i, f, o, g] before entering the kernel.
    """
    H = torch_params[0][1].shape[1]
    perm = jnp.concatenate([jnp.arange(0, 2 * H),
                            jnp.arange(3 * H, 4 * H),
                            jnp.arange(2 * H, 3 * H)])
    kparams = []
    for (w_ih, w_hh, b_ih, b_hh) in torch_params:
        kparams.append((jnp.transpose(w_ih[perm, :]),       # (D_in, 4H)
                        jnp.transpose(w_hh[perm, :]),       # (H, 4H)
                        (b_ih + b_hh)[perm][None, :]))      # (1, 4H)
    return _blstm_pallas(x, kparams)


# ----------------------------- pure-JAX reference -----------------------------
def _lstm_layer_ref(x, w_ih, w_hh, b_ih, b_hh):
    """PyTorch-layout reference: w_ih (4H,D_in), w_hh (4H,H), gates [i,f,g,o]."""
    T, B, _ = x.shape
    H = w_hh.shape[1]

    def step(carry, x_t):
        h, c = carry
        gates = x_t @ w_ih.T + h @ w_hh.T + b_ih + b_hh
        i_g = jax.nn.sigmoid(gates[:, 0 * H:1 * H])
        f_g = jax.nn.sigmoid(gates[:, 1 * H:2 * H])
        g_g = jnp.tanh(gates[:, 2 * H:3 * H])
        o_g = jax.nn.sigmoid(gates[:, 3 * H:4 * H])
        c_new = f_g * c + i_g * g_g
        h_new = o_g * jnp.tanh(c_new)
        return (h_new, c_new), h_new

    init = (jnp.zeros((B, H), jnp.float32), jnp.zeros((B, H), jnp.float32))
    (h_n, c_n), out = jax.lax.scan(step, init, x)
    return out, h_n, c_n


def blstm_forward_ref(x, torch_params):
    h_ns, c_ns = [], []
    layer_in = x
    for l in range(NUM_LAYERS):
        w_ih, w_hh, b_ih, b_hh = torch_params[l]
        layer_in, h_n, c_n = _lstm_layer_ref(layer_in, w_ih, w_hh, b_ih, b_hh)
        h_ns.append(h_n)
        c_ns.append(c_n)
    return layer_in, (jnp.stack(h_ns, axis=0), jnp.stack(c_ns, axis=0))


# --------------------------------- main ---------------------------------------
if __name__ == "__main__":
    key = jax.random.PRNGKey(0)
    T, B = 8, 3  # (seq_len, batch) in torch.nn.LSTM default (T, N, C_in) layout

    # Deterministic synthetic parameters, same shapes as torch.nn.LSTM(10, 20, 2):
    # weight_ih_l{l}: (4H, D_in), weight_hh_l{l}: (4H, H), bias_*: (4H,).
    params = []
    scale = 1.0 / jnp.sqrt(jnp.float32(HIDDEN_SIZE))
    for l in range(NUM_LAYERS):
        d_in = INPUT_SIZE if l == 0 else HIDDEN_SIZE
        key, k1, k2, k3, k4 = jax.random.split(key, 5)
        w_ih = jax.random.uniform(k1, (4 * HIDDEN_SIZE, d_in), jnp.float32,
                                  -scale, scale)
        w_hh = jax.random.uniform(k2, (4 * HIDDEN_SIZE, HIDDEN_SIZE), jnp.float32,
                                  -scale, scale)
        b_ih = jax.random.uniform(k3, (4 * HIDDEN_SIZE,), jnp.float32, -scale, scale)
        b_hh = jax.random.uniform(k4, (4 * HIDDEN_SIZE,), jnp.float32, -scale, scale)
        params.append((w_ih, w_hh, b_ih, b_hh))

    key, kx = jax.random.split(key)
    x = jax.random.normal(kx, (T, B, INPUT_SIZE), jnp.float32)

    out, (h_n, c_n) = blstm_forward(x, params)
    jax.block_until_ready((out, h_n, c_n))

    out_r, (h_r, c_r) = blstm_forward_ref(x, params)
    assert out.shape == (T, B, HIDDEN_SIZE)
    assert h_n.shape == (NUM_LAYERS, B, HIDDEN_SIZE)
    assert c_n.shape == (NUM_LAYERS, B, HIDDEN_SIZE)
    assert jnp.allclose(out, out_r, atol=5e-5, rtol=5e-5)
    assert jnp.allclose(h_n, h_r, atol=5e-5, rtol=5e-5)
    assert jnp.allclose(c_n, c_r, atol=5e-5, rtol=5e-5)

    print("KERNEL_OK")
</pallas_src>

<mosaic_0001>
module attributes {stable_mosaic.version = 11 : i64} {
  func.func @_blstm_kernel(%arg0: memref<64x10xf32, #tpu.memory_space<vmem>>, %arg1: memref<10x80xf32, #tpu.memory_space<vmem>>, %arg2: memref<20x80xf32, #tpu.memory_space<vmem>>, %arg3: memref<1x80xf32, #tpu.memory_space<vmem>>, %arg4: memref<20x80xf32, #tpu.memory_space<vmem>>, %arg5: memref<20x80xf32, #tpu.memory_space<vmem>>, %arg6: memref<1x80xf32, #tpu.memory_space<vmem>>, %arg7: memref<64x20xf32, #tpu.memory_space<vmem>>, %arg8: memref<2x8x20xf32, #tpu.memory_space<vmem>>, %arg9: memref<2x8x20xf32, #tpu.memory_space<vmem>>, %arg10: memref<64x80xf32, #tpu.memory_space<vmem>>, %arg11: memref<64x20xf32, #tpu.memory_space<vmem>>) attributes {dimension_semantics = [], scalar_prefetch = 0 : i64, scratch_operands = 2 : i64, tpu.core_type = #tpu.core_type<tc>} {
    %c0 = arith.constant 0 : index
    %c0_0 = arith.constant 0 : index
    %0 = vector.load %arg0[%c0, %c0_0] : memref<64x10xf32, #tpu.memory_space<vmem>>, vector<64x10xf32>
    %c0_1 = arith.constant 0 : index
    %c0_2 = arith.constant 0 : index
    %1 = vector.load %arg1[%c0_1, %c0_2] : memref<10x80xf32, #tpu.memory_space<vmem>>, vector<10x80xf32>
    %cst = arith.constant dense<0.000000e+00> : vector<64x80xf32>
    %2 = tpu.matmul %0, %1, %cst {dimension_numbers = #tpu.dot_dimension_numbers<[1], [0], [0], [1], [0, 0, 1, 1], [], []>} : vector<64x10xf32>, vector<10x80xf32>, vector<64x80xf32> -> vector<64x80xf32>
    %c0_3 = arith.constant 0 : index
    %c0_4 = arith.constant 0 : index
    %3 = vector.load %arg3[%c0_3, %c0_4] : memref<1x80xf32, #tpu.memory_space<vmem>>, vector<1x80xf32>
    %4 = vector.broadcast %3 : vector<1x80xf32> to vector<64x80xf32>
    %5 = arith.addf %2, %4 : vector<64x80xf32>
    %c0_5 = arith.constant 0 : index
    %c0_6 = arith.constant 0 : index
    %6 = vector.load %arg10[%c0_5, %c0_6] : memref<64x80xf32, #tpu.memory_space<vmem>>, vector<64x80xf32>
    tpu.vector_store %arg10[%c0_5, %c0_6], %5 {strides = array<i32>} : memref<64x80xf32, #tpu.memory_space<vmem>>, vector<64x80xf32>,
    %c0_7 = arith.constant 0 : index
    %c0_8 = arith.constant 0 : index
    %7 = vector.load %arg2[%c0_7, %c0_8] : memref<20x80xf32, #tpu.memory_space<vmem>>, vector<20x80xf32>
    %cst_9 = arith.constant 0.000000e+00 : f32
    %8 = vector.broadcast %cst_9 : f32 to vector<8x20xf32>
    %c0_i32 = arith.constant 0 : i32
    %c8_i32 = arith.constant 8 : i32
    %9 = arith.muli %c0_i32, %c8_i32 : i32
    %10 = tpu.assume_multiple %9, 8 : i32
    %11 = arith.index_cast %10 : i32 to index
    %c0_10 = arith.constant 0 : index
    %12 = vector.load %arg10[%11, %c0_10] : memref<64x80xf32, #tpu.memory_space<vmem>>, vector<8x80xf32>
    %cst_11 = arith.constant dense<0.000000e+00> : vector<8x80xf32>
    %13 = tpu.matmul %8, %7, %cst_11 {dimension_numbers = #tpu.dot_dimension_numbers<[1], [0], [0], [1], [0, 0, 1, 1], [], []>} : vector<8x20xf32>, vector<20x80xf32>, vector<8x80xf32> -> vector<8x80xf32>
    %14 = arith.addf %12, %13 : vector<8x80xf32>
    %15 = vector.extract_strided_slice %14 {offsets = [0, 0], sizes = [8, 60], strides = [1, 1]} : vector<8x80xf32> to vector<8x60xf32>
    %16 = arith.negf %15 : vector<8x60xf32>
    %17 = math.exp %16 : vector<8x60xf32>
    %cst_12 = arith.constant 1.000000e+00 : f32
    %18 = vector.broadcast %cst_12 : f32 to vector<8x60xf32>
    %19 = arith.addf %18, %17 : vector<8x60xf32>
    %20 = arith.divf %18, %19 : vector<8x60xf32>
    %21 = vector.extract_strided_slice %20 {offsets = [0, 0], sizes = [8, 20], strides = [1, 1]} : vector<8x60xf32> to vector<8x20xf32>
    %22 = vector.extract_strided_slice %20 {offsets = [0, 20], sizes = [8, 20], strides = [1, 1]} : vector<8x60xf32> to vector<8x20xf32>
    %23 = vector.extract_strided_slice %20 {offsets = [0, 40], sizes = [8, 20], strides = [1, 1]} : vector<8x60xf32> to vector<8x20xf32>
    %24 = vector.extract_strided_slice %14 {offsets = [0, 60], sizes = [8, 20], strides = [1, 1]} : vector<8x80xf32> to vector<8x20xf32>
    %25 = math.tanh %24 : vector<8x20xf32>
    %26 = arith.mulf %22, %8 : vector<8x20xf32>
    %27 = arith.mulf %21, %25 : vector<8x20xf32>
    %28 = arith.addf %26, %27 : vector<8x20xf32>
    %29 = math.tanh %28 : vector<8x20xf32>
    %30 = arith.mulf %23, %29 : vector<8x20xf32>
    %31 = arith.index_cast %10 : i32 to index
    %c0_13 = arith.constant 0 : index
    %32 = vector.load %arg11[%31, %c0_13] : memref<64x20xf32, #tpu.memory_space<vmem>>, vector<8x20xf32>
    tpu.vector_store %arg11[%31, %c0_13], %30 {strides = array<i32>} : memref<64x20xf32, #tpu.memory_space<vmem>>, vector<8x20xf32>,
    %c1_i32 = arith.constant 1 : i32
    %c8_i32_14 = arith.constant 8 : i32
    %33 = arith.muli %c1_i32, %c8_i32_14 : i32
    %34 = tpu.assume_multiple %33, 8 : i32
    %35 = arith.index_cast %34 : i32 to index
    %c0_15 = arith.constant 0 : index
    %36 = vector.load %arg10[%35, %c0_15] : memref<64x80xf32, #tpu.memory_space<vmem>>, vector<8x80xf32>
    %cst_16 = arith.constant dense<0.000000e+00> : vector<8x80xf32>
    %37 = tpu.matmul %30, %7, %cst_16 {dimension_numbers = #tpu.dot_dimension_numbers<[1], [0], [0], [1], [0, 0, 1, 1], [], []>} : vector<8x20xf32>, vector<20x80xf32>, vector<8x80xf32> -> vector<8x80xf32>
    %38 = arith.addf %36, %37 : vector<8x80xf32>
    %39 = vector.extract_strided_slice %38 {offsets = [0, 0], sizes = [8, 60], strides = [1, 1]} : vector<8x80xf32> to vector<8x60xf32>
    %40 = arith.negf %39 : vector<8x60xf32>
    %41 = math.exp %40 : vector<8x60xf32>
    %cst_17 = arith.constant 1.000000e+00 : f32
    %42 = vector.broadcast %cst_17 : f32 to vector<8x60xf32>
    %43 = arith.addf %42, %41 : vector<8x60xf32>
    %44 = arith.divf %42, %43 : vector<8x60xf32>
    %45 = vector.extract_strided_slice %44 {offsets = [0, 0], sizes = [8, 20], strides = [1, 1]} : vector<8x60xf32> to vector<8x20xf32>
    %46 = vector.extract_strided_slice %44 {offsets = [0, 20], sizes = [8, 20], strides = [1, 1]} : vector<8x60xf32> to vector<8x20xf32>
    %47 = vector.extract_strided_slice %44 {offsets = [0, 40], sizes = [8, 20], strides = [1, 1]} : vector<8x60xf32> to vector<8x20xf32>
    %48 = vector.extract_strided_slice %38 {offsets = [0, 60], sizes = [8, 20], strides = [1, 1]} : vector<8x80xf32> to vector<8x20xf32>
    %49 = math.tanh %48 : vector<8x20xf32>
    %50 = arith.mulf %46, %28 : vector<8x20xf32>
    %51 = arith.mulf %45, %49 : vector<8x20xf32>
    %52 = arith.addf %50, %51 : vector<8x20xf32>
    %53 = math.tanh %52 : vector<8x20xf32>
    %54 = arith.mulf %47, %53 : vector<8x20xf32>
    %55 = arith.index_cast %34 : i32 to index
    %c0_18 = arith.constant 0 : index
    %56 = vector.load %arg11[%55, %c0_18] : memref<64x20xf32, #tpu.memory_space<vmem>>, vector<8x20xf32>
    tpu.vector_store %arg11[%55, %c0_18], %54 {strides = array<i32>} : memref<64x20xf32, #tpu.memory_space<vmem>>, vector<8x20xf32>,
    %c2_i32 = arith.constant 2 : i32
    %c8_i32_19 = arith.constant 8 : i32
    %57 = arith.muli %c2_i32, %c8_i32_19 : i32
    %58 = tpu.assume_multiple %57, 8 : i32
    %59 = arith.index_cast %58 : i32 to index
    %c0_20 = arith.constant 0 : index
    %60 = vector.load %arg10[%59, %c0_20] : memref<64x80xf32, #tpu.memory_space<vmem>>, vector<8x80xf32>
    %cst_21 = arith.constant dense<0.000000e+00> : vector<8x80xf32>
    %61 = tpu.matmul %54, %7, %cst_21 {dimension_numbers = #tpu.dot_dimension_numbers<[1], [0], [0], [1], [0, 0, 1, 1], [], []>} : vector<8x20xf32>, vector<20x80xf32>, vector<8x80xf32> -> vector<8x80xf32>
    %62 = arith.addf %60, %61 : vector<8x80xf32>
    %63 = vector.extract_strided_slice %62 {offsets = [0, 0], sizes = [8, 60], strides = [1, 1]} : vector<8x80xf32> to vector<8x60xf32>
    %64 = arith.negf %63 : vector<8x60xf32>
    %65 = math.exp %64 : vector<8x60xf32>
    %cst_22 = arith.constant 1.000000e+00 : f32
    %66 = vector.broadcast %cst_22 : f32 to vector<8x60xf32>
    %67 = arith.addf %66, %65 : vector<8x60xf32>
    %68 = arith.divf %66, %67 : vector<8x60xf32>
    %69 = vector.extract_strided_slice %68 {offsets = [0, 0], sizes = [8, 20], strides = [1, 1]} : vector<8x60xf32> to vector<8x20xf32>
    %70 = vector.extract_strided_slice %68 {offsets = [0, 20], sizes = [8, 20], strides = [1, 1]} : vector<8x60xf32> to vector<8x20xf32>
    %71 = vector.extract_strided_slice %68 {offsets = [0, 40], sizes = [8, 20], strides = [1, 1]} : vector<8x60xf32> to vector<8x20xf32>
    %72 = vector.extract_strided_slice %62 {offsets = [0, 60], sizes = [8, 20], strides = [1, 1]} : vector<8x80xf32> to vector<8x20xf32>
    %73 = math.tanh %72 : vector<8x20xf32>
    %74 = arith.mulf %70, %52 : vector<8x20xf32>
    %75 = arith.mulf %69, %73 : vector<8x20xf32>
    %76 = arith.addf %74, %75 : vector<8x20xf32>
    %77 = math.tanh %76 : vector<8x20xf32>
    %78 = arith.mulf %71, %77 : vector<8x20xf32>
    %79 = arith.index_cast %58 : i32 to index
    %c0_23 = arith.constant 0 : index
    %80 = vector.load %arg11[%79, %c0_23] : memref<64x20xf32, #tpu.memory_space<vmem>>, vector<8x20xf32>
    tpu.vector_store %arg11[%79, %c0_23], %78 {strides = array<i32>} : memref<64x20xf32, #tpu.memory_space<vmem>>, vector<8x20xf32>,
    %c3_i32 = arith.constant 3 : i32
    %c8_i32_24 = arith.constant 8 : i32
    %81 = arith.muli %c3_i32, %c8_i32_24 : i32
    %82 = tpu.assume_multiple %81, 8 : i32
    %83 = arith.index_cast %82 : i32 to index
    %c0_25 = arith.constant 0 : index
    %84 = vector.load %arg10[%83, %c0_25] : memref<64x80xf32, #tpu.memory_space<vmem>>, vector<8x80xf32>
    %cst_26 = arith.constant dense<0.000000e+00> : vector<8x80xf32>
    %85 = tpu.matmul %78, %7, %cst_26 {dimension_numbers = #tpu.dot_dimension_numbers<[1], [0], [0], [1], [0, 0, 1, 1], [], []>} : vector<8x20xf32>, vector<20x80xf32>, vector<8x80xf32> -> vector<8x80xf32>
    %86 = arith.addf %84, %85 : vector<8x80xf32>
    %87 = vector.extract_strided_slice %86 {offsets = [0, 0], sizes = [8, 60], strides = [1, 1]} : vector<8x80xf32> to vector<8x60xf32>
    %88 = arith.negf %87 : vector<8x60xf32>
    %89 = math.exp %88 : vector<8x60xf32>
    %cst_27 = arith.constant 1.000000e+00 : f32
    %90 = vector.broadcast %cst_27 : f32 to vector<8x60xf32>
    %91 = arith.addf %90, %89 : vector<8x60xf32>
    %92 = arith.divf %90, %91 : vector<8x60xf32>
    %93 = vector.extract_strided_slice %92 {offsets = [0, 0], sizes = [8, 20], strides = [1, 1]} : vector<8x60xf32> to vector<8x20xf32>
    %94 = vector.extract_strided_slice %92 {offsets = [0, 20], sizes = [8, 20], strides = [1, 1]} : vector<8x60xf32> to vector<8x20xf32>
    %95 = vector.extract_strided_slice %92 {offsets = [0, 40], sizes = [8, 20], strides = [1, 1]} : vector<8x60xf32> to vector<8x20xf32>
    %96 = vector.extract_strided_slice %86 {offsets = [0, 60], sizes = [8, 20], strides = [1, 1]} : vector<8x80xf32> to vector<8x20xf32>
    %97 = math.tanh %96 : vector<8x20xf32>
    %98 = arith.mulf %94, %76 : vector<8x20xf32>
    %99 = arith.mulf %93, %97 : vector<8x20xf32>
    %100 = arith.addf %98, %99 : vector<8x20xf32>
    %101 = math.tanh %100 : vector<8x20xf32>
    %102 = arith.mulf %95, %101 : vector<8x20xf32>
    %103 = arith.index_cast %82 : i32 to index
    %c0_28 = arith.constant 0 : index
    %104 = vector.load %arg11[%103, %c0_28] : memref<64x20xf32, #tpu.memory_space<vmem>>, vector<8x20xf32>
    tpu.vector_store %arg11[%103, %c0_28], %102 {strides = array<i32>} : memref<64x20xf32, #tpu.memory_space<vmem>>, vector<8x20xf32>,
    %c4_i32 = arith.constant 4 : i32
    %c8_i32_29 = arith.constant 8 : i32
    %105 = arith.muli %c4_i32, %c8_i32_29 : i32
    %106 = tpu.assume_multiple %105, 8 : i32
    %107 = arith.index_cast %106 : i32 to index
    %c0_30 = arith.constant 0 : index
    %108 = vector.load %arg10[%107, %c0_30] : memref<64x80xf32, #tpu.memory_space<vmem>>, vector<8x80xf32>
    %cst_31 = arith.constant dense<0.000000e+00> : vector<8x80xf32>
    %109 = tpu.matmul %102, %7, %cst_31 {dimension_numbers = #tpu.dot_dimension_numbers<[1], [0], [0], [1], [0, 0, 1, 1], [], []>} : vector<8x20xf32>, vector<20x80xf32>, vector<8x80xf32> -> vector<8x80xf32>
    %110 = arith.addf %108, %109 : vector<8x80xf32>
    %111 = vector.extract_strided_slice %110 {offsets = [0, 0], sizes = [8, 60], strides = [1, 1]} : vector<8x80xf32> to vector<8x60xf32>
    %112 = arith.negf %111 : vector<8x60xf32>
    %113 = math.exp %112 : vector<8x60xf32>
    %cst_32 = arith.constant 1.000000e+00 : f32
    %114 = vector.broadcast %cst_32 : f32 to vector<8x60xf32>
    %115 = arith.addf %114, %113 : vector<8x60xf32>
    %116 = arith.divf %114, %115 : vector<8x60xf32>
    %117 = vector.extract_strided_slice %116 {offsets = [0, 0], sizes = [8, 20], strides = [1, 1]} : vector<8x60xf32> to vector<8x20xf32>
    %118 = vector.extract_strided_slice %116 {offsets = [0, 20], sizes = [8, 20], strides = [1, 1]} : vector<8x60xf32> to vector<8x20xf32>
    %119 = vector.extract_strided_slice %116 {offsets = [0, 40], sizes = [8, 20], strides = [1, 1]} : vector<8x60xf32> to vector<8x20xf32>
    %120 = vector.extract_strided_slice %110 {offsets = [0, 60], sizes = [8, 20], strides = [1, 1]} : vector<8x80xf32> to vector<8x20xf32>
    %121 = math.tanh %120 : vector<8x20xf32>
    %122 = arith.mulf %118, %100 : vector<8x20xf32>
    %123 = arith.mulf %117, %121 : vector<8x20xf32>
    %124 = arith.addf %122, %123 : vector<8x20xf32>
    %125 = math.tanh %124 : vector<8x20xf32>
    %126 = arith.mulf %119, %125 : vector<8x20xf32>
    %127 = arith.index_cast %106 : i32 to index
    %c0_33 = arith.constant 0 : index
    %128 = vector.load %arg11[%127, %c0_33] : memref<64x20xf32, #tpu.memory_space<vmem>>, vector<8x20xf32>
    tpu.vector_store %arg11[%127, %c0_33], %126 {strides = array<i32>} : memref<64x20xf32, #tpu.memory_space<vmem>>, vector<8x20xf32>,
    %c5_i32 = arith.constant 5 : i32
    %c8_i32_34 = arith.constant 8 : i32
    %129 = arith.muli %c5_i32, %c8_i32_34 : i32
    %130 = tpu.assume_multiple %129, 8 : i32
    %131 = arith.index_cast %130 : i32 to index
    %c0_35 = arith.constant 0 : index
    %132 = vector.load %arg10[%131, %c0_35] : memref<64x80xf32, #tpu.memory_space<vmem>>, vector<8x80xf32>
    %cst_36 = arith.constant dense<0.000000e+00> : vector<8x80xf32>
    %133 = tpu.matmul %126, %7, %cst_36 {dimension_numbers = #tpu.dot_dimension_numbers<[1], [0], [0], [1], [0, 0, 1, 1], [], []>} : vector<8x20xf32>, vector<20x80xf32>, vector<8x80xf32> -> vector<8x80xf32>
    %134 = arith.addf %132, %133 : vector<8x80xf32>
    %135 = vector.extract_strided_slice %134 {offsets = [0, 0], sizes = [8, 60], strides = [1, 1]} : vector<8x80xf32> to vector<8x60xf32>
    %136 = arith.negf %135 : vector<8x60xf32>
    %137 = math.exp %136 : vector<8x60xf32>
    %cst_37 = arith.constant 1.000000e+00 : f32
    %138 = vector.broadcast %cst_37 : f32 to vector<8x60xf32>
    %139 = arith.addf %138, %137 : vector<8x60xf32>
    %140 = arith.divf %138, %139 : vector<8x60xf32>
    %141 = vector.extract_strided_slice %140 {offsets = [0, 0], sizes = [8, 20], strides = [1, 1]} : vector<8x60xf32> to vector<8x20xf32>
    %142 = vector.extract_strided_slice %140 {offsets = [0, 20], sizes = [8, 20], strides = [1, 1]} : vector<8x60xf32> to vector<8x20xf32>
    %143 = vector.extract_strided_slice %140 {offsets = [0, 40], sizes = [8, 20], strides = [1, 1]} : vector<8x60xf32> to vector<8x20xf32>
    %144 = vector.extract_strided_slice %134 {offsets = [0, 60], sizes = [8, 20], strides = [1, 1]} : vector<8x80xf32> to vector<8x20xf32>
    %145 = math.tanh %144 : vector<8x20xf32>
    %146 = arith.mulf %142, %124 : vector<8x20xf32>
    %147 = arith.mulf %141, %145 : vector<8x20xf32>
    %148 = arith.addf %146, %147 : vector<8x20xf32>
    %149 = math.tanh %148 : vector<8x20xf32>
    %150 = arith.mulf %143, %149 : vector<8x20xf32>
    %151 = arith.index_cast %130 : i32 to index
    %c0_38 = arith.constant 0 : index
    %152 = vector.load %arg11[%151, %c0_38] : memref<64x20xf32, #tpu.memory_space<vmem>>, vector<8x20xf32>
    tpu.vector_store %arg11[%151, %c0_38], %150 {strides = array<i32>} : memref<64x20xf32, #tpu.memory_space<vmem>>, vector<8x20xf32>,
    %c6_i32 = arith.constant 6 : i32
    %c8_i32_39 = arith.constant 8 : i32
    %153 = arith.muli %c6_i32, %c8_i32_39 : i32
    %154 = tpu.assume_multiple %153, 8 : i32
    %155 = arith.index_cast %154 : i32 to index
    %c0_40 = arith.constant 0 : index
    %156 = vector.load %arg10[%155, %c0_40] : memref<64x80xf32, #tpu.memory_space<vmem>>, vector<8x80xf32>
    %cst_41 = arith.constant dense<0.000000e+00> : vector<8x80xf32>
    %157 = tpu.matmul %150, %7, %cst_41 {dimension_numbers = #tpu.dot_dimension_numbers<[1], [0], [0], [1], [0, 0, 1, 1], [], []>} : vector<8x20xf32>, vector<20x80xf32>, vector<8x80xf32> -> vector<8x80xf32>
    %158 = arith.addf %156, %157 : vector<8x80xf32>
    %159 = vector.extract_strided_slice %158 {offsets = [0, 0], sizes = [8, 60], strides = [1, 1]} : vector<8x80xf32> to vector<8x60xf32>
    %160 = arith.negf %159 : vector<8x60xf32>
    %161 = math.exp %160 : vector<8x60xf32>
    %cst_42 = arith.constant 1.000000e+00 : f32
    %162 = vector.broadcast %cst_42 : f32 to vector<8x60xf32>
    %163 = arith.addf %162, %161 : vector<8x60xf32>
    %164 = arith.divf %162, %163 : vector<8x60xf32>
    %165 = vector.extract_strided_slice %164 {offsets = [0, 0], sizes = [8, 20], strides = [1, 1]} : vector<8x60xf32> to vector<8x20xf32>
    %166 = vector.extract_strided_slice %164 {offsets = [0, 20], sizes = [8, 20], strides = [1, 1]} : vector<8x60xf32> to vector<8x20xf32>
    %167 = vector.extract_strided_slice %164 {offsets = [0, 40], sizes = [8, 20], strides = [1, 1]} : vector<8x60xf32> to vector<8x20xf32>
    %168 = vector.extract_strided_slice %158 {offsets = [0, 60], sizes = [8, 20], strides = [1, 1]} : vector<8x80xf32> to vector<8x20xf32>
    %169 = math.tanh %168 : vector<8x20xf32>
    %170 = arith.mulf %166, %148 : vector<8x20xf32>
    %171 = arith.mulf %165, %169 : vector<8x20xf32>
    %172 = arith.addf %170, %171 : vector<8x20xf32>
    %173 = math.tanh %172 : vector<8x20xf32>
    %174 = arith.mulf %167, %173 : vector<8x20xf32>
    %175 = arith.index_cast %154 : i32 to index
    %c0_43 = arith.constant 0 : index
    %176 = vector.load %arg11[%175, %c0_43] : memref<64x20xf32, #tpu.memory_space<vmem>>, vector<8x20xf32>
    tpu.vector_store %arg11[%175, %c0_43], %174 {strides = array<i32>} : memref<64x20xf32, #tpu.memory_space<vmem>>, vector<8x20xf32>,
    %c7_i32 = arith.constant 7 : i32
    %c8_i32_44 = arith.constant 8 : i32
    %177 = arith.muli %c7_i32, %c8_i32_44 : i32
    %178 = tpu.assume_multiple %177, 8 : i32
    %179 = arith.index_cast %178 : i32 to index
    %c0_45 = arith.constant 0 : index
    %180 = vector.load %arg10[%179, %c0_45] : memref<64x80xf32, #tpu.memory_space<vmem>>, vector<8x80xf32>
    %cst_46 = arith.constant dense<0.000000e+00> : vector<8x80xf32>
    %181 = tpu.matmul %174, %7, %cst_46 {dimension_numbers = #tpu.dot_dimension_numbers<[1], [0], [0], [1], [0, 0, 1, 1], [], []>} : vector<8x20xf32>, vector<20x80xf32>, vector<8x80xf32> -> vector<8x80xf32>
    %182 = arith.addf %180, %181 : vector<8x80xf32>
    %183 = vector.extract_strided_slice %182 {offsets = [0, 0], sizes = [8, 60], strides = [1, 1]} : vector<8x80xf32> to vector<8x60xf32>
    %184 = arith.negf %183 : vector<8x60xf32>
    %185 = math.exp %184 : vector<8x60xf32>
    %cst_47 = arith.constant 1.000000e+00 : f32
    %186 = vector.broadcast %cst_47 : f32 to vector<8x60xf32>
    %187 = arith.addf %186, %185 : vector<8x60xf32>
    %188 = arith.divf %186, %187 : vector<8x60xf32>
    %189 = vector.extract_strided_slice %188 {offsets = [0, 0], sizes = [8, 20], strides = [1, 1]} : vector<8x60xf32> to vector<8x20xf32>
    %190 = vector.extract_strided_slice %188 {offsets = [0, 20], sizes = [8, 20], strides = [1, 1]} : vector<8x60xf32> to vector<8x20xf32>
    %191 = vector.extract_strided_slice %188 {offsets = [0, 40], sizes = [8, 20], strides = [1, 1]} : vector<8x60xf32> to vector<8x20xf32>
    %192 = vector.extract_strided_slice %182 {offsets = [0, 60], sizes = [8, 20], strides = [1, 1]} : vector<8x80xf32> to vector<8x20xf32>
    %193 = math.tanh %192 : vector<8x20xf32>
    %194 = arith.mulf %190, %172 : vector<8x20xf32>
    %195 = arith.mulf %189, %193 : vector<8x20xf32>
    %196 = arith.addf %194, %195 : vector<8x20xf32>
    %197 = math.tanh %196 : vector<8x20xf32>
    %198 = arith.mulf %191, %197 : vector<8x20xf32>
    %199 = arith.index_cast %178 : i32 to index
    %c0_48 = arith.constant 0 : index
    %200 = vector.load %arg11[%199, %c0_48] : memref<64x20xf32, #tpu.memory_space<vmem>>, vector<8x20xf32>
    tpu.vector_store %arg11[%199, %c0_48], %198 {strides = array<i32>} : memref<64x20xf32, #tpu.memory_space<vmem>>, vector<8x20xf32>,
    %c8_i32_49 = arith.constant 8 : i32
    %c0_50 = arith.constant 0 : index
    %c0_51 = arith.constant 0 : index
    %c0_52 = arith.constant 0 : index
    %201 = vector.load %arg8[%c0_50, %c0_51, %c0_52] : memref<2x8x20xf32, #tpu.memory_space<vmem>>, vector<1x8x20xf32>
    %202 = vector.shape_cast %201 : vector<1x8x20xf32> to vector<8x20xf32>
    %203 = vector.shape_cast %198 : vector<8x20xf32> to vector<1x8x20xf32>
    tpu.vector_store %arg8[%c0_50, %c0_51, %c0_52], %203 {strides = array<i32>} : memref<2x8x20xf32, #tpu.memory_space<vmem>>, vector<1x8x20xf32>,
    %c0_53 = arith.constant 0 : index
    %c0_54 = arith.constant 0 : index
    %c0_55 = arith.constant 0 : index
    %204 = vector.load %arg9[%c0_53, %c0_54, %c0_55] : memref<2x8x20xf32, #tpu.memory_space<vmem>>, vector<1x8x20xf32>
    %205 = vector.shape_cast %204 : vector<1x8x20xf32> to vector<8x20xf32>
    %206 = vector.shape_cast %196 : vector<8x20xf32> to vector<1x8x20xf32>
    tpu.vector_store %arg9[%c0_53, %c0_54, %c0_55], %206 {strides = array<i32>} : memref<2x8x20xf32, #tpu.memory_space<vmem>>, vector<1x8x20xf32>,
    %c0_56 = arith.constant 0 : index
    %c0_57 = arith.constant 0 : index
    %207 = vector.load %arg11[%c0_56, %c0_57] : memref<64x20xf32, #tpu.memory_space<vmem>>, vector<64x20xf32>
    %c0_58 = arith.constant 0 : index
    %c0_59 = arith.constant 0 : index
    %208 = vector.load %arg4[%c0_58, %c0_59] : memref<20x80xf32, #tpu.memory_space<vmem>>, vector<20x80xf32>
    %cst_60 = arith.constant dense<0.000000e+00> : vector<64x80xf32>
    %209 = tpu.matmul %207, %208, %cst_60 {dimension_numbers = #tpu.dot_dimension_numbers<[1], [0], [0], [1], [0, 0, 1, 1], [], []>} : vector<64x20xf32>, vector<20x80xf32>, vector<64x80xf32> -> vector<64x80xf32>
    %c0_61 = arith.constant 0 : index
    %c0_62 = arith.constant 0 : index
    %210 = vector.load %arg6[%c0_61, %c0_62] : memref<1x80xf32, #tpu.memory_space<vmem>>, vector<1x80xf32>
    %211 = vector.broadcast %210 : vector<1x80xf32> to vector<64x80xf32>
    %212 = arith.addf %209, %211 : vector<64x80xf32>
    %c0_63 = arith.constant 0 : index
    %c0_64 = arith.constant 0 : index
    %213 = vector.load %arg10[%c0_63, %c0_64] : memref<64x80xf32, #tpu.memory_space<vmem>>, vector<64x80xf32>
    tpu.vector_store %arg10[%c0_63, %c0_64], %212 {strides = array<i32>} : memref<64x80xf32, #tpu.memory_space<vmem>>, vector<64x80xf32>,
    %c0_65 = arith.constant 0 : index
    %c0_66 = arith.constant 0 : index
    %214 = vector.load %arg5[%c0_65, %c0_66] : memref<20x80xf32, #tpu.memory_space<vmem>>, vector<20x80xf32>
    %cst_67 = arith.constant 0.000000e+00 : f32
    %215 = vector.broadcast %cst_67 : f32 to vector<8x20xf32>
    %c0_i32_68 = arith.constant 0 : i32
    %c8_i32_69 = arith.constant 8 : i32
    %216 = arith.muli %c0_i32_68, %c8_i32_69 : i32
    %217 = tpu.assume_multiple %216, 8 : i32
    %218 = arith.index_cast %217 : i32 to index
    %c0_70 = arith.constant 0 : index
    %219 = vector.load %arg10[%218, %c0_70] : memref<64x80xf32, #tpu.memory_space<vmem>>, vector<8x80xf32>
    %cst_71 = arith.constant dense<0.000000e+00> : vector<8x80xf32>
    %220 = tpu.matmul %215, %214, %cst_71 {dimension_numbers = #tpu.dot_dimension_numbers<[1], [0], [0], [1], [0, 0, 1, 1], [], []>} : vector<8x20xf32>, vector<20x80xf32>, vector<8x80xf32> -> vector<8x80xf32>
    %221 = arith.addf %219, %220 : vector<8x80xf32>
    %222 = vector.extract_strided_slice %221 {offsets = [0, 0], sizes = [8, 60], strides = [1, 1]} : vector<8x80xf32> to vector<8x60xf32>
    %223 = arith.negf %222 : vector<8x60xf32>
    %224 = math.exp %223 : vector<8x60xf32>
    %cst_72 = arith.constant 1.000000e+00 : f32
    %225 = vector.broadcast %cst_72 : f32 to vector<8x60xf32>
    %226 = arith.addf %225, %224 : vector<8x60xf32>
    %227 = arith.divf %225, %226 : vector<8x60xf32>
    %228 = vector.extract_strided_slice %227 {offsets = [0, 0], sizes = [8, 20], strides = [1, 1]} : vector<8x60xf32> to vector<8x20xf32>
    %229 = vector.extract_strided_slice %227 {offsets = [0, 20], sizes = [8, 20], strides = [1, 1]} : vector<8x60xf32> to vector<8x20xf32>
    %230 = vector.extract_strided_slice %227 {offsets = [0, 40], sizes = [8, 20], strides = [1, 1]} : vector<8x60xf32> to vector<8x20xf32>
    %231 = vector.extract_strided_slice %221 {offsets = [0, 60], sizes = [8, 20], strides = [1, 1]} : vector<8x80xf32> to vector<8x20xf32>
    %232 = math.tanh %231 : vector<8x20xf32>
    %233 = arith.mulf %229, %215 : vector<8x20xf32>
    %234 = arith.mulf %228, %232 : vector<8x20xf32>
    %235 = arith.addf %233, %234 : vector<8x20xf32>
    %236 = math.tanh %235 : vector<8x20xf32>
    %237 = arith.mulf %230, %236 : vector<8x20xf32>
    %238 = arith.index_cast %217 : i32 to index
    %c0_73 = arith.constant 0 : index
    %239 = vector.load %arg7[%238, %c0_73] : memref<64x20xf32, #tpu.memory_space<vmem>>, vector<8x20xf32>
    tpu.vector_store %arg7[%238, %c0_73], %237 {strides = array<i32>} : memref<64x20xf32, #tpu.memory_space<vmem>>, vector<8x20xf32>,
    %c1_i32_74 = arith.constant 1 : i32
    %c8_i32_75 = arith.constant 8 : i32
    %240 = arith.muli %c1_i32_74, %c8_i32_75 : i32
    %241 = tpu.assume_multiple %240, 8 : i32
    %242 = arith.index_cast %241 : i32 to index
    %c0_76 = arith.constant 0 : index
    %243 = vector.load %arg10[%242, %c0_76] : memref<64x80xf32, #tpu.memory_space<vmem>>, vector<8x80xf32>
    %cst_77 = arith.constant dense<0.000000e+00> : vector<8x80xf32>
    %244 = tpu.matmul %237, %214, %cst_77 {dimension_numbers = #tpu.dot_dimension_numbers<[1], [0], [0], [1], [0, 0, 1, 1], [], []>} : vector<8x20xf32>, vector<20x80xf32>, vector<8x80xf32> -> vector<8x80xf32>
    %245 = arith.addf %243, %244 : vector<8x80xf32>
    %246 = vector.extract_strided_slice %245 {offsets = [0, 0], sizes = [8, 60], strides = [1, 1]} : vector<8x80xf32> to vector<8x60xf32>
    %247 = arith.negf %246 : vector<8x60xf32>
    %248 = math.exp %247 : vector<8x60xf32>
    %cst_78 = arith.constant 1.000000e+00 : f32
    %249 = vector.broadcast %cst_78 : f32 to vector<8x60xf32>
    %250 = arith.addf %249, %248 : vector<8x60xf32>
    %251 = arith.divf %249, %250 : vector<8x60xf32>
    %252 = vector.extract_strided_slice %251 {offsets = [0, 0], sizes = [8, 20], strides = [1, 1]} : vector<8x60xf32> to vector<8x20xf32>
    %253 = vector.extract_strided_slice %251 {offsets = [0, 20], sizes = [8, 20], strides = [1, 1]} : vector<8x60xf32> to vector<8x20xf32>
    %254 = vector.extract_strided_slice %251 {offsets = [0, 40], sizes = [8, 20], strides = [1, 1]} : vector<8x60xf32> to vector<8x20xf32>
    %255 = vector.extract_strided_slice %245 {offsets = [0, 60], sizes = [8, 20], strides = [1, 1]} : vector<8x80xf32> to vector<8x20xf32>
    %256 = math.tanh %255 : vector<8x20xf32>
    %257 = arith.mulf %253, %235 : vector<8x20xf32>
    %258 = arith.mulf %252, %256 : vector<8x20xf32>
    %259 = arith.addf %257, %258 : vector<8x20xf32>
    %260 = math.tanh %259 : vector<8x20xf32>
    %261 = arith.mulf %254, %260 : vector<8x20xf32>
    %262 = arith.index_cast %241 : i32 to index
    %c0_79 = arith.constant 0 : index
    %263 = vector.load %arg7[%262, %c0_79] : memref<64x20xf32, #tpu.memory_space<vmem>>, vector<8x20xf32>
    tpu.vector_store %arg7[%262, %c0_79], %261 {strides = array<i32>} : memref<64x20xf32, #tpu.memory_space<vmem>>, vector<8x20xf32>,
    %c2_i32_80 = arith.constant 2 : i32
    %c8_i32_81 = arith.constant 8 : i32
    %264 = arith.muli %c2_i32_80, %c8_i32_81 : i32
    %265 = tpu.assume_multiple %264, 8 : i32
    %266 = arith.index_cast %265 : i32 to index
    %c0_82 = arith.constant 0 : index
    %267 = vector.load %arg10[%266, %c0_82] : memref<64x80xf32, #tpu.memory_space<vmem>>, vector<8x80xf32>
    %cst_83 = arith.constant dense<0.000000e+00> : vector<8x80xf32>
    %268 = tpu.matmul %261, %214, %cst_83 {dimension_numbers = #tpu.dot_dimension_numbers<[1], [0], [0], [1], [0, 0, 1, 1], [], []>} : vector<8x20xf32>, vector<20x80xf32>, vector<8x80xf32> -> vector<8x80xf32>
    %269 = arith.addf %267, %268 : vector<8x80xf32>
    %270 = vector.extract_strided_slice %269 {offsets = [0, 0], sizes = [8, 60], strides = [1, 1]} : vector<8x80xf32> to vector<8x60xf32>
    %271 = arith.negf %270 : vector<8x60xf32>
    %272 = math.exp %271 : vector<8x60xf32>
    %cst_84 = arith.constant 1.000000e+00 : f32
    %273 = vector.broadcast %cst_84 : f32 to vector<8x60xf32>
    %274 = arith.addf %273, %272 : vector<8x60xf32>
    %275 = arith.divf %273, %274 : vector<8x60xf32>
    %276 = vector.extract_strided_slice %275 {offsets = [0, 0], sizes = [8, 20], strides = [1, 1]} : vector<8x60xf32> to vector<8x20xf32>
    %277 = vector.extract_strided_slice %275 {offsets = [0, 20], sizes = [8, 20], strides = [1, 1]} : vector<8x60xf32> to vector<8x20xf32>
    %278 = vector.extract_strided_slice %275 {offsets = [0, 40], sizes = [8, 20], strides = [1, 1]} : vector<8x60xf32> to vector<8x20xf32>
    %279 = vector.extract_strided_slice %269 {offsets = [0, 60], sizes = [8, 20], strides = [1, 1]} : vector<8x80xf32> to vector<8x20xf32>
    %280 = math.tanh %279 : vector<8x20xf32>
    %281 = arith.mulf %277, %259 : vector<8x20xf32>
    %282 = arith.mulf %276, %280 : vector<8x20xf32>
    %283 = arith.addf %281, %282 : vector<8x20xf32>
    %284 = math.tanh %283 : vector<8x20xf32>
    %285 = arith.mulf %278, %284 : vector<8x20xf32>
    %286 = arith.index_cast %265 : i32 to index
    %c0_85 = arith.constant 0 : index
    %287 = vector.load %arg7[%286, %c0_85] : memref<64x20xf32, #tpu.memory_space<vmem>>, vector<8x20xf32>
    tpu.vector_store %arg7[%286, %c0_85], %285 {strides = array<i32>} : memref<64x20xf32, #tpu.memory_space<vmem>>, vector<8x20xf32>,
    %c3_i32_86 = arith.constant 3 : i32
    %c8_i32_87 = arith.constant 8 : i32
    %288 = arith.muli %c3_i32_86, %c8_i32_87 : i32
    %289 = tpu.assume_multiple %288, 8 : i32
    %290 = arith.index_cast %289 : i32 to index
    %c0_88 = arith.constant 0 : index
    %291 = vector.load %arg10[%290, %c0_88] : memref<64x80xf32, #tpu.memory_space<vmem>>, vector<8x80xf32>
    %cst_89 = arith.constant dense<0.000000e+00> : vector<8x80xf32>
    %292 = tpu.matmul %285, %214, %cst_89 {dimension_numbers = #tpu.dot_dimension_numbers<[1], [0], [0], [1], [0, 0, 1, 1], [], []>} : vector<8x20xf32>, vector<20x80xf32>, vector<8x80xf32> -> vector<8x80xf32>
    %293 = arith.addf %291, %292 : vector<8x80xf32>
    %294 = vector.extract_strided_slice %293 {offsets = [0, 0], sizes = [8, 60], strides = [1, 1]} : vector<8x80xf32> to vector<8x60xf32>
    %295 = arith.negf %294 : vector<8x60xf32>
    %296 = math.exp %295 : vector<8x60xf32>
    %cst_90 = arith.constant 1.000000e+00 : f32
    %297 = vector.broadcast %cst_90 : f32 to vector<8x60xf32>
    %298 = arith.addf %297, %296 : vector<8x60xf32>
    %299 = arith.divf %297, %298 : vector<8x60xf32>
    %300 = vector.extract_strided_slice %299 {offsets = [0, 0], sizes = [8, 20], strides = [1, 1]} : vector<8x60xf32> to vector<8x20xf32>
    %301 = vector.extract_strided_slice %299 {offsets = [0, 20], sizes = [8, 20], strides = [1, 1]} : vector<8x60xf32> to vector<8x20xf32>
    %302 = vector.extract_strided_slice %299 {offsets = [0, 40], sizes = [8, 20], strides = [1, 1]} : vector<8x60xf32> to vector<8x20xf32>
    %303 = vector.extract_strided_slice %293 {offsets = [0, 60], sizes = [8, 20], strides = [1, 1]} : vector<8x80xf32> to vector<8x20xf32>
    %304 = math.tanh %303 : vector<8x20xf32>
    %305 = arith.mulf %301, %283 : vector<8x20xf32>
    %306 = arith.mulf %300, %304 : vector<8x20xf32>
    %307 = arith.addf %305, %306 : vector<8x20xf32>
    %308 = math.tanh %307 : vector<8x20xf32>
    %309 = arith.mulf %302, %308 : vector<8x20xf32>
    %310 = arith.index_cast %289 : i32 to index
    %c0_91 = arith.constant 0 : index
    %311 = vector.load %arg7[%310, %c0_91] : memref<64x20xf32, #tpu.memory_space<vmem>>, vector<8x20xf32>
    tpu.vector_store %arg7[%310, %c0_91], %309 {strides = array<i32>} : memref<64x20xf32, #tpu.memory_space<vmem>>, vector<8x20xf32>,
    %c4_i32_92 = arith.constant 4 : i32
    %c8_i32_93 = arith.constant 8 : i32
    %312 = arith.muli %c4_i32_92, %c8_i32_93 : i32
    %313 = tpu.assume_multiple %312, 8 : i32
    %314 = arith.index_cast %313 : i32 to index
    %c0_94 = arith.constant 0 : index
    %315 = vector.load %arg10[%314, %c0_94] : memref<64x80xf32, #tpu.memory_space<vmem>>, vector<8x80xf32>
    %cst_95 = arith.constant dense<0.000000e+00> : vector<8x80xf32>
    %316 = tpu.matmul %309, %214, %cst_95 {dimension_numbers = #tpu.dot_dimension_numbers<[1], [0], [0], [1], [0, 0, 1, 1], [], []>} : vector<8x20xf32>, vector<20x80xf32>, vector<8x80xf32> -> vector<8x80xf32>
    %317 = arith.addf %315, %316 : vector<8x80xf32>
    %318 = vector.extract_strided_slice %317 {offsets = [0, 0], sizes = [8, 60], strides = [1, 1]} : vector<8x80xf32> to vector<8x60xf32>
    %319 = arith.negf %318 : vector<8x60xf32>
    %320 = math.exp %319 : vector<8x60xf32>
    %cst_96 = arith.constant 1.000000e+00 : f32
    %321 = vector.broadcast %cst_96 : f32 to vector<8x60xf32>
    %322 = arith.addf %321, %320 : vector<8x60xf32>
    %323 = arith.divf %321, %322 : vector<8x60xf32>
    %324 = vector.extract_strided_slice %323 {offsets = [0, 0], sizes = [8, 20], strides = [1, 1]} : vector<8x60xf32> to vector<8x20xf32>
    %325 = vector.extract_strided_slice %323 {offsets = [0, 20], sizes = [8, 20], strides = [1, 1]} : vector<8x60xf32> to vector<8x20xf32>
    %326 = vector.extract_strided_slice %323 {offsets = [0, 40], sizes = [8, 20], strides = [1, 1]} : vector<8x60xf32> to vector<8x20xf32>
    %327 = vector.extract_strided_slice %317 {offsets = [0, 60], sizes = [8, 20], strides = [1, 1]} : vector<8x80xf32> to vector<8x20xf32>
    %328 = math.tanh %327 : vector<8x20xf32>
    %329 = arith.mulf %325, %307 : vector<8x20xf32>
    %330 = arith.mulf %324, %328 : vector<8x20xf32>
    %331 = arith.addf %329, %330 : vector<8x20xf32>
    %332 = math.tanh %331 : vector<8x20xf32>
    %333 = arith.mulf %326, %332 : vector<8x20xf32>
    %334 = arith.index_cast %313 : i32 to index
    %c0_97 = arith.constant 0 : index
    %335 = vector.load %arg7[%334, %c0_97] : memref<64x20xf32, #tpu.memory_space<vmem>>, vector<8x20xf32>
    tpu.vector_store %arg7[%334, %c0_97], %333 {strides = array<i32>} : memref<64x20xf32, #tpu.memory_space<vmem>>, vector<8x20xf32>,
    %c5_i32_98 = arith.constant 5 : i32
    %c8_i32_99 = arith.constant 8 : i32
    %336 = arith.muli %c5_i32_98, %c8_i32_99 : i32
    %337 = tpu.assume_multiple %336, 8 : i32
    %338 = arith.index_cast %337 : i32 to index
    %c0_100 = arith.constant 0 : index
    %339 = vector.load %arg10[%338, %c0_100] : memref<64x80xf32, #tpu.memory_space<vmem>>, vector<8x80xf32>
    %cst_101 = arith.constant dense<0.000000e+00> : vector<8x80xf32>
    %340 = tpu.matmul %333, %214, %cst_101 {dimension_numbers = #tpu.dot_dimension_numbers<[1], [0], [0], [1], [0, 0, 1, 1], [], []>} : vector<8x20xf32>, vector<20x80xf32>, vector<8x80xf32> -> vector<8x80xf32>
    %341 = arith.addf %339, %340 : vector<8x80xf32>
    %342 = vector.extract_strided_slice %341 {offsets = [0, 0], sizes = [8, 60], strides = [1, 1]} : vector<8x80xf32> to vector<8x60xf32>
    %343 = arith.negf %342 : vector<8x60xf32>
    %344 = math.exp %343 : vector<8x60xf32>
    %cst_102 = arith.constant 1.000000e+00 : f32
    %345 = vector.broadcast %cst_102 : f32 to vector<8x60xf32>
    %346 = arith.addf %345, %344 : vector<8x60xf32>
    %347 = arith.divf %345, %346 : vector<8x60xf32>
    %348 = vector.extract_strided_slice %347 {offsets = [0, 0], sizes = [8, 20], strides = [1, 1]} : vector<8x60xf32> to vector<8x20xf32>
    %349 = vector.extract_strided_slice %347 {offsets = [0, 20], sizes = [8, 20], strides = [1, 1]} : vector<8x60xf32> to vector<8x20xf32>
    %350 = vector.extract_strided_slice %347 {offsets = [0, 40], sizes = [8, 20], strides = [1, 1]} : vector<8x60xf32> to vector<8x20xf32>
    %351 = vector.extract_strided_slice %341 {offsets = [0, 60], sizes = [8, 20], strides = [1, 1]} : vector<8x80xf32> to vector<8x20xf32>
    %352 = math.tanh %351 : vector<8x20xf32>
    %353 = arith.mulf %349, %331 : vector<8x20xf32>
    %354 = arith.mulf %348, %352 : vector<8x20xf32>
    %355 = arith.addf %353, %354 : vector<8x20xf32>
    %356 = math.tanh %355 : vector<8x20xf32>
    %357 = arith.mulf %350, %356 : vector<8x20xf32>
    %358 = arith.index_cast %337 : i32 to index
    %c0_103 = arith.constant 0 : index
    %359 = vector.load %arg7[%358, %c0_103] : memref<64x20xf32, #tpu.memory_space<vmem>>, vector<8x20xf32>
    tpu.vector_store %arg7[%358, %c0_103], %357 {strides = array<i32>} : memref<64x20xf32, #tpu.memory_space<vmem>>, vector<8x20xf32>,
    %c6_i32_104 = arith.constant 6 : i32
    %c8_i32_105 = arith.constant 8 : i32
    %360 = arith.muli %c6_i32_104, %c8_i32_105 : i32
    %361 = tpu.assume_multiple %360, 8 : i32
    %362 = arith.index_cast %361 : i32 to index
    %c0_106 = arith.constant 0 : index
    %363 = vector.load %arg10[%362, %c0_106] : memref<64x80xf32, #tpu.memory_space<vmem>>, vector<8x80xf32>
    %cst_107 = arith.constant dense<0.000000e+00> : vector<8x80xf32>
    %364 = tpu.matmul %357, %214, %cst_107 {dimension_numbers = #tpu.dot_dimension_numbers<[1], [0], [0], [1], [0, 0, 1, 1], [], []>} : vector<8x20xf32>, vector<20x80xf32>, vector<8x80xf32> -> vector<8x80xf32>
    %365 = arith.addf %363, %364 : vector<8x80xf32>
    %366 = vector.extract_strided_slice %365 {offsets = [0, 0], sizes = [8, 60], strides = [1, 1]} : vector<8x80xf32> to vector<8x60xf32>
    %367 = arith.negf %366 : vector<8x60xf32>
    %368 = math.exp %367 : vector<8x60xf32>
    %cst_108 = arith.constant 1.000000e+00 : f32
    %369 = vector.broadcast %cst_108 : f32 to vector<8x60xf32>
    %370 = arith.addf %369, %368 : vector<8x60xf32>
    %371 = arith.divf %369, %370 : vector<8x60xf32>
    %372 = vector.extract_strided_slice %371 {offsets = [0, 0], sizes = [8, 20], strides = [1, 1]} : vector<8x60xf32> to vector<8x20xf32>
    %373 = vector.extract_strided_slice %371 {offsets = [0, 20], sizes = [8, 20], strides = [1, 1]} : vector<8x60xf32> to vector<8x20xf32>
    %374 = vector.extract_strided_slice %371 {offsets = [0, 40], sizes = [8, 20], strides = [1, 1]} : vector<8x60xf32> to vector<8x20xf32>
    %375 = vector.extract_strided_slice %365 {offsets = [0, 60], sizes = [8, 20], strides = [1, 1]} : vector<8x80xf32> to vector<8x20xf32>
    %376 = math.tanh %375 : vector<8x20xf32>
    %377 = arith.mulf %373, %355 : vector<8x20xf32>
    %378 = arith.mulf %372, %376 : vector<8x20xf32>
    %379 = arith.addf %377, %378 : vector<8x20xf32>
    %380 = math.tanh %379 : vector<8x20xf32>
    %381 = arith.mulf %374, %380 : vector<8x20xf32>
    %382 = arith.index_cast %361 : i32 to index
    %c0_109 = arith.constant 0 : index
    %383 = vector.load %arg7[%382, %c0_109] : memref<64x20xf32, #tpu.memory_space<vmem>>, vector<8x20xf32>
    tpu.vector_store %arg7[%382, %c0_109], %381 {strides = array<i32>} : memref<64x20xf32, #tpu.memory_space<vmem>>, vector<8x20xf32>,
    %c7_i32_110 = arith.constant 7 : i32
    %c8_i32_111 = arith.constant 8 : i32
    %384 = arith.muli %c7_i32_110, %c8_i32_111 : i32
    %385 = tpu.assume_multiple %384, 8 : i32
    %386 = arith.index_cast %385 : i32 to index
    %c0_112 = arith.constant 0 : index
    %387 = vector.load %arg10[%386, %c0_112] : memref<64x80xf32, #tpu.memory_space<vmem>>, vector<8x80xf32>
    %cst_113 = arith.constant dense<0.000000e+00> : vector<8x80xf32>
    %388 = tpu.matmul %381, %214, %cst_113 {dimension_numbers = #tpu.dot_dimension_numbers<[1], [0], [0], [1], [0, 0, 1, 1], [], []>} : vector<8x20xf32>, vector<20x80xf32>, vector<8x80xf32> -> vector<8x80xf32>
    %389 = arith.addf %387, %388 : vector<8x80xf32>
    %390 = vector.extract_strided_slice %389 {offsets = [0, 0], sizes = [8, 60], strides = [1, 1]} : vector<8x80xf32> to vector<8x60xf32>
    %391 = arith.negf %390 : vector<8x60xf32>
    %392 = math.exp %391 : vector<8x60xf32>
    %cst_114 = arith.constant 1.000000e+00 : f32
    %393 = vector.broadcast %cst_114 : f32 to vector<8x60xf32>
    %394 = arith.addf %393, %392 : vector<8x60xf32>
    %395 = arith.divf %393, %394 : vector<8x60xf32>
    %396 = vector.extract_strided_slice %395 {offsets = [0, 0], sizes = [8, 20], strides = [1, 1]} : vector<8x60xf32> to vector<8x20xf32>
    %397 = vector.extract_strided_slice %395 {offsets = [0, 20], sizes = [8, 20], strides = [1, 1]} : vector<8x60xf32> to vector<8x20xf32>
    %398 = vector.extract_strided_slice %395 {offsets = [0, 40], sizes = [8, 20], strides = [1, 1]} : vector<8x60xf32> to vector<8x20xf32>
    %399 = vector.extract_strided_slice %389 {offsets = [0, 60], sizes = [8, 20], strides = [1, 1]} : vector<8x80xf32> to vector<8x20xf32>
    %400 = math.tanh %399 : vector<8x20xf32>
    %401 = arith.mulf %397, %379 : vector<8x20xf32>
    %402 = arith.mulf %396, %400 : vector<8x20xf32>
    %403 = arith.addf %401, %402 : vector<8x20xf32>
    %404 = math.tanh %403 : vector<8x20xf32>
    %405 = arith.mulf %398, %404 : vector<8x20xf32>
    %406 = arith.index_cast %385 : i32 to index
    %c0_115 = arith.constant 0 : index
    %407 = vector.load %arg7[%406, %c0_115] : memref<64x20xf32, #tpu.memory_space<vmem>>, vector<8x20xf32>
    tpu.vector_store %arg7[%406, %c0_115], %405 {strides = array<i32>} : memref<64x20xf32, #tpu.memory_space<vmem>>, vector<8x20xf32>,
    %c8_i32_116 = arith.constant 8 : i32
    %c1 = arith.constant 1 : index
    %c0_117 = arith.constant 0 : index
    %c0_118 = arith.constant 0 : index
    %408 = vector.load %arg8[%c1, %c0_117, %c0_118] : memref<2x8x20xf32, #tpu.memory_space<vmem>>, vector<1x8x20xf32>
    %409 = vector.shape_cast %408 : vector<1x8x20xf32> to vector<8x20xf32>
    %410 = vector.shape_cast %405 : vector<8x20xf32> to vector<1x8x20xf32>
    tpu.vector_store %arg8[%c1, %c0_117, %c0_118], %410 {strides = array<i32>} : memref<2x8x20xf32, #tpu.memory_space<vmem>>, vector<1x8x20xf32>,
    %c1_119 = arith.constant 1 : index
    %c0_120 = arith.constant 0 : index
    %c0_121 = arith.constant 0 : index
    %411 = vector.load %arg9[%c1_119, %c0_120, %c0_121] : memref<2x8x20xf32, #tpu.memory_space<vmem>>, vector<1x8x20xf32>
    %412 = vector.shape_cast %411 : vector<1x8x20xf32> to vector<8x20xf32>
    %413 = vector.shape_cast %403 : vector<8x20xf32> to vector<1x8x20xf32>
    tpu.vector_store %arg9[%c1_119, %c0_120, %c0_121], %413 {strides = array<i32>} : memref<2x8x20xf32, #tpu.memory_space<vmem>>, vector<1x8x20xf32>,
    return
  }
}

</mosaic_0001>

<bundles_post_ra>
// kernel: blstm_forward.1
= control target key start
LH: loop header
LB: loop body
LE: loop exit
PB: predicated region body
PF: predicated region fallthrough
CT: control target
= control target key end

     0   :  { %vm71_vm0 = vcmask 1041408   ;;  %vm46_vm1 = vcmask 80896   ;;  %vm2587_vm2 = vmmov 1   ;;  %v2588_v2 = vmov 0.0|0.0   ;;  %s2591_s23 = smov 68   ;;  %s2593_s24 = smov 88   ;;  %s3030_s1 = inlined_call_operand.vmem [shape: f32[10,80], index: 1, kind: input, shape index: {}]   ;;  %s3031_s0 = inlined_call_operand.vmem [shape: f32[64,10], index: 0, kind: input, shape index: {}]   ;;  %s3032_s2 = inlined_call_operand.vmem [shape: f32[20,80], index: 2, kind: input, shape index: {}]   ;;  %s3033_s3 = inlined_call_operand.vmem [shape: f32[1,80], index: 3, kind: input, shape index: {}]   ;;  %s3034_s4 = inlined_call_operand.vmem [shape: f32[20,80], index: 4, kind: input, shape index: {}]   ;;  %s3035_s6 = inlined_call_operand.vmem [shape: f32[1,80], index: 6, kind: input, shape index: {}]   ;;  %s3036_s5 = inlined_call_operand.vmem [shape: f32[20,80], index: 5, kind: input, shape index: {}]   ;;  %s3037_s7 = inlined_call_operand.vmem [shape: f32[64,20], index: 7, kind: output, shape index: {0}]   ;;  %s3038_s8 = inlined_call_operand.vmem [shape: f32[2,8,20], index: 8, kind: output, shape index: {1}]   ;;  %s3039_s9 = inlined_call_operand.vmem [shape: f32[2,8,20], index: 9, kind: output, shape index: {2}]  }
   0x1   :  { %v37_v0 = vld [vmem:[%s3030_s1] sm:$0xff]  ;;  %v38_v1 = vld [vmem:[%s3030_s1 + $0x8] sm:$0x3]  ;;  %vm2394_vm3 = vmpackc.low %vm71_vm0, %vm2587_vm2  ;;  %2399 = vmatprep.subr.bf16.mxu1 %v2588_v2  ;;  %vm2589_vm4 = vmmov 0   ;;  %v2590_v6 = vmov 0.0   ;;  %vm197_vm5 = vcmask 1043456  }
   0x2   :  { %v2393_v3 = vpack.c.bf16 %v38_v1, %v37_v0  ;;  %v29_v4 = vld [vmem:[%s3031_s0] sm:$0xff]  ;;  %2237 = vmatprep.mubr.msk.f32.mxu1 %vm2589_vm4, %v2590_v6  ;;  %v190_v7 = vld [vmem:[%s3032_s2 + $0x8] sm:$0xff]  ;;  %v2675_v10 = vld [vmem:[%s3032_s2 + $0x10] sm:$0xf]  ;;  %vm180_vm6 = vcmask 654336   ;;  %vm193_vm7 = vcmask 162816  }
   0x3   :  { %v189_v5 = vld [vmem:[%s3032_s2] sm:$0xff]  ;;  %2219 = vmatprep.mubr.msk.f32.mxu0 %vm46_vm1, %v29_v4  ;;  %v30_v9 = vld [vmem:[%s3031_s0 + $0x8] sm:$0xff]  ;;  %v31_v48 = vld [vmem:[%s3031_s0 + $0x10] sm:$0xff]  ;;  %s2594_s19 = smov 108  }
   0x4   :  { %2395 = vmatprep.subr.msk.bf16.mxu0 %vm2394_vm3, %v2393_v3  ;;  %v2664_v8 = vpack.c.bf16 %v190_v7, %v189_v5  ;;  %v2697_v11 = vld [vmem:[%s3033_s3] ss:$0 sm:$0xff]  ;;  %s2592_s3 = smov 20   ;;  %v32_v49 = vld [vmem:[%s3031_s0 + $0x18] sm:$0xff] }
   0x5   :  { %2398 = vmatpush3.bf16.msk.msra.mxu0 %vm2394_vm3, %v2393_v3 }
   0x6   :  { %2401 = vmatpush3.bf16.msra.mxu1 %v2664_v8  ;;  %2408 = vmatprep.subr.bf16.mxu0 %v2588_v2 }
   0x7   :  { %2235 = vmatprep.subr.mxu1 %v2590_v6 }
   0x8   :  { %2220 = vmatmul.mubr.msk.f32.vlgmr.msra.gmra.mrb[0].mxu0 %vm46_vm1, %v30_v9 }
   0x9   :  { %2410 = vmatpush3.bf16.msra.mxu0 %v2664_v8  ;;  %2222 = vmatprep.mubr.msk.f32.mxu0 %vm46_vm1, %v31_v48 }
   0xa   :  { %2236 = vmatpush3.msk.msra.mxu1 %vm197_vm5, %v2675_v10  ;;  %2262 = vmatprep.subr.mxu0 %v2590_v6 }
   0xb   :  { %2238 = vmatmul.mubr.f32.vlgmr.msra.gmra.mrb[0].mxu1 %v2590_v6  ;;  %2402 = vmatprep.subr.bf16.mxu1 %v2588_v2 }
   0xc   :  { %2404 = vmatpush3.bf16.msra.mxu1 %v2664_v8  ;;  %2246 = vmatprep.mubr.msk.f32.mxu1 %vm2589_vm4, %v2590_v6 }
   0xd   :  { %2244 = vmatprep.subr.mxu1 %v2590_v6  ;;  %2263 = vmatpush3.msk.msra.mxu0 %vm197_vm5, %v2675_v10 }
   0xe   :  { %2414 = vmatprep.subr.bf16.mxu0 %v2588_v2  ;;  %2223 = vmatmul.mubr.msk.f32.gmra.mrb[2].mxu0 %vm46_vm1, %v32_v49 }
  0x10   :  { %2245 = vmatpush3.msk.msra.mxu1 %vm197_vm5, %v2675_v10 }
  0x11   :  { %2405 = vmatprep.subr.bf16.mxu1 %v2588_v2 }
  0xdb   :  { %v2221_v12 = vpop.f32.mrb[0].mxu0 }
  0xdc   :  { %v147_v13 = vadd.f32 %v2221_v12, %v2697_v11  ;;  %v141_v14 = vpop.f32.mrb[1].mxu0 }
  0xdd   :  { %v142_v15 = vadd.f32 %v2697_v11, %v141_v14  ;;  %v34_v14 = vld [vmem:[%s3031_s0 + $0x28] sm:$0xff] }
  0xde   :  { %182 = vst.msk [vmem:[#allocation2 + $0x8] sm:$0xff] %vm180_vm6, %v147_v13  ;;  %v267_v16 = vpop.f32.mrb[0].mxu1  ;;  %v33_v13 = vld [vmem:[%s3031_s0 + $0x20] sm:$0xff] }
  0xdf   :  { %181 = vst.msk [vmem:[#allocation2] sm:$0xff] %vm180_vm6, %v142_v15  ;;  %v2239_v17 = vpop.f32.mrb[1].mxu1  ;;  %v35_v15 = vld [vmem:[%s3031_s0 + $0x30] sm:$0xff]  ;;  %2225 = vmatprep.mubr.msk.f32.mxu0 %vm46_vm1, %v33_v13 }
  0xe0   :  { %2226 = vmatmul.mubr.msk.f32.gmra.mrb[4].mxu0 %vm46_vm1, %v34_v14 }
  0xe1   :  { %v2224_v53 = vpop.f32.mrb[2].mxu0  ;;  %2228 = vmatprep.mubr.msk.f32.mxu0 %vm46_vm1, %v35_v15 }
  0xe2   :  { %v157_v54 = vadd.f32 %v2224_v53, %v2697_v11  ;;  %v151_v55 = vpop.f32.mrb[3].mxu0 }
  0xe3   :  { %v152_v56 = vadd.f32 %v2697_v11, %v151_v55 }
  0xe4   :  { %184 = vst.msk [vmem:[#allocation2 + $0x18] sm:$0xff] %vm180_vm6, %v157_v54 }
  0xe5   :  { %v302_v34 = vld [vmem:[#allocation2 + $0x8] sm:$0xff]  ;;  %183 = vst.msk [vmem:[#allocation2 + $0x10] sm:$0xff] %vm180_vm6, %v152_v56 }
  0xe6   :  { %v192_v18 = vld [vmem:[#allocation2] sm:$0xff] }
  0xe7   :  { %v271_v19 = vadd.f32 %v267_v16, %v192_v18  ;;  %v36_v16 = vld [vmem:[%s3031_s0 + $0x38] sm:$0xff] }
  0xe8   :  { %2229 = vmatmul.mubr.msk.f32.gmra.mrb[6].mxu0 %vm46_vm1, %v36_v16 }
  0xe9   :  { %2459 = vtanh.f32 %v271_v19  ;;  %v2066_v21 = vmul.f32 -1.442695, %v271_v19  ;;  %2264 = vmatprep.mubr.msk.f32.mxu0 %vm2589_vm4, %v2590_v6 }
  0xeb   :  { %2461 = vpow2.f32 %v2066_v21 }
  0xec   :  { %v407_v58 = vld [vmem:[#allocation2 + $0x10] sm:$0xff] }
  0xf3   :  { %v2460_v20 = vpop.eup %2459 }
  0xf4   :  { %281 = vrot.lane.b32.xlu0 %v2460_v20, %s2591_s23 }
  0xf5   :  { %v2462_v22 = vpop.eup %2461 }
  0xf6   :  { %v275_v23 = vadd.f32 1.0, %v2462_v22 }
  0xf8   :  { %2463 = vrcp.f32 %v275_v23 }
 0x102   :  { %v2464_v24 = vpop.eup %2463 }
 0x103   :  { %v279_v27 = vmul.f32 0.0, %v2464_v24 }
 0x166   :  { %v282_v25 = vpop.permute.xlu0 %281 }
 0x167   :  { %v284_v26 = vmul.f32 %v2464_v24, %v282_v25 }
 0x169   :  { %286 = vrot.lane.b32.xlu0 %v284_v26, %s2592_s3 }
 0x1b3   :  { %v2227_v20 = vpop.f32.mrb[4].mxu0 }
 0x1b4   :  { %v167_v21 = vadd.f32 %v2227_v20, %v2697_v11  ;;  %v161_v22 = vpop.f32.mrb[5].mxu0 }
 0x1b5   :  { %v162_v23 = vadd.f32 %v2697_v11, %v161_v22 }
 0x1b6   :  { %186 = vst.msk [vmem:[#allocation2 + $0x28] sm:$0xff] %vm180_vm6, %v167_v21 }
 0x1b7   :  { %185 = vst.msk [vmem:[#allocation2 + $0x20] sm:$0xff] %vm180_vm6, %v162_v23 }
 0x1db   :  { %v287_v28 = vpop.permute.xlu0 %286 }
 0x1dc   :  { %v289_v29 = vadd.f32 %v287_v28, %v279_v27 }
 0x1de   :  { %2465 = vtanh.f32 %v289_v29 }
 0x1e8   :  { %v2466_v30 = vpop.eup %2465 }
 0x1e9   :  { %292 = vrot.lane.b32.xlu1 %v2466_v30, %s2592_s3 }
 0x25b   :  { %v293_v31 = vpop.permute.xlu1 %292 }
 0x25c   :  { %v295_v32 = vmul.f32 %v2464_v24, %v293_v31  ;;  %v2230_v24 = vpop.f32.mrb[6].mxu0 }
 0x25d   :  { %v177_v25 = vadd.f32 %v2230_v24, %v2697_v11  ;;  %v171_v26 = vpop.f32.mrb[7].mxu0  ;;  %v1052_v24 = vld [vmem:[%s3034_s4 + $0x10] sm:$0xf] }
 0x25e   :  { %297 = vrot.lane.b32.xlu1 %v295_v32, %s2593_s24  ;;  %v172_v27 = vadd.f32 %v2697_v11, %v171_v26  ;;  %v512_v11 = vld [vmem:[#allocation2 + $0x18] sm:$0xff] }
 0x25f   :  { %188 = vst.msk [vmem:[#allocation2 + $0x38] sm:$0xff] %vm180_vm6, %v177_v25 }
 0x260   :  { %187 = vst.msk [vmem:[#allocation2 + $0x30] sm:$0xff] %vm180_vm6, %v172_v27 }
 0x2d0   :  { %v298_v33 = vpop.permute.xlu1 %297 }
 0x2d1   :  { %300 = vst.msk [vmem:[#allocation3] sm:$0xff] %vm193_vm7, %v298_v33  ;;  %2247 = vmatmul.mubr.msk.f32.vlgmr.msra.gmra.mrb[2].mxu1 %vm193_vm7, %v298_v33 }
 0x2d2   :  { %2407 = vmatpush3.bf16.msra.mxu1 %v2664_v8  ;;  %2255 = vmatprep.mubr.msk.f32.mxu1 %vm2589_vm4, %v2590_v6 }
 0x2d3   :  { %2253 = vmatprep.subr.mxu1 %v2590_v6 }
 0x2d6   :  { %2254 = vmatpush3.msk.msra.mxu1 %vm197_vm5, %v2675_v10 }
 0x2d7   :  { %2411 = vmatprep.subr.bf16.mxu1 %v2588_v2 }
 0x2d8   :  { %v1042_v25 = vld [vmem:[#allocation3] sm:$0xff] }
 0x3a4   :  { %v371_v35 = vpop.f32.mrb[2].mxu1 }
 0x3a5   :  { %v375_v36 = vadd.f32 %v371_v35, %v302_v34  ;;  %v2248_v37 = vpop.f32.mrb[3].mxu1 }
 0x3a7   :  { %2467 = vtanh.f32 %v375_v36  ;;  %v2069_v39 = vmul.f32 -1.442695, %v375_v36 }
 0x3a9   :  { %2469 = vpow2.f32 %v2069_v39 }
 0x3b1   :  { %v2468_v38 = vpop.eup %2467 }
 0x3b2   :  { %385 = vrot.lane.b32.xlu0 %v2468_v38, %s2591_s23 }
 0x3b3   :  { %v2470_v40 = vpop.eup %2469 }
 0x3b4   :  { %v379_v41 = vadd.f32 1.0, %v2470_v40 }
 0x3b6   :  { %2471 = vrcp.f32 %v379_v41 }
 0x3c0   :  { %v2472_v42 = vpop.eup %2471 }
 0x3c1   :  { %v383_v45 = vmul.f32 %v2472_v42, %v289_v29 }
 0x424   :  { %v386_v43 = vpop.permute.xlu0 %385 }
 0x425   :  { %v388_v44 = vmul.f32 %v2472_v42, %v386_v43 }
 0x427   :  { %390 = vrot.lane.b32.xlu1 %v388_v44, %s2592_s3 }
 0x499   :  { %v391_v46 = vpop.permute.xlu1 %390 }
 0x49a   :  { %v393_v47 = vadd.f32 %v391_v46, %v383_v45  ;;  %v617_v46 = vld [vmem:[#allocation2 + $0x20] sm:$0xff] }
 0x49c   :  { %2473 = vtanh.f32 %v393_v47 }
 0x4a6   :  { %v2474_v50 = vpop.eup %2473 }
 0x4a7   :  { %396 = vrot.lane.b32.xlu0 %v2474_v50, %s2592_s3 }
 0x519   :  { %v397_v51 = vpop.permute.xlu0 %396 }
 0x51a   :  { %v399_v52 = vmul.f32 %v2472_v42, %v397_v51 }
 0x51c   :  { %401 = vrot.lane.b32.xlu1 %v399_v52, %s2593_s24 }
 0x58e   :  { %v402_v57 = vpop.permute.xlu1 %401 }
 0x58f   :  { %405 = vst.msk [vmem:[#allocation3 + $0x8] sm:$0xff] %vm193_vm7, %v402_v57  ;;  %2256 = vmatmul.mubr.msk.f32.vlgmr.msra.gmra.mrb[4].mxu1 %vm193_vm7, %v402_v57 }
 0x590   :  { %2413 = vmatpush3.bf16.msra.mxu1 %v2664_v8  ;;  %2273 = vmatprep.mubr.msk.f32.mxu1 %vm2589_vm4, %v2590_v6 }
 0x591   :  { %2271 = vmatprep.subr.mxu1 %v2590_v6 }
 0x594   :  { %2272 = vmatpush3.msk.msra.mxu1 %vm197_vm5, %v2675_v10 }
 0x595   :  { %2417 = vmatprep.subr.bf16.mxu1 %v2588_v2 }
 0x596   :  { %v1043_v26 = vld [vmem:[#allocation3 + $0x8] sm:$0xff] }
 0x662   :  { %v476_v59 = vpop.f32.mrb[4].mxu1 }
 0x663   :  { %v480_v60 = vadd.f32 %v476_v59, %v407_v58  ;;  %v2257_v61 = vpop.f32.mrb[5].mxu1 }
 0x665   :  { %2475 = vtanh.f32 %v480_v60  ;;  %v2072_v63 = vmul.f32 -1.442695, %v480_v60 }
 0x667   :  { %2477 = vpow2.f32 %v2072_v63 }
 0x66f   :  { %v2476_v62 = vpop.eup %2475 }
 0x670   :  { %490 = vrot.lane.b32.xlu0 %v2476_v62, %s2591_s23 }
 0x671   :  { %v2478_v0 = vpop.eup %2477 }
 0x672   :  { %v484_v1 = vadd.f32 1.0, %v2478_v0  ;;  %v722_v0 = vld [vmem:[#allocation2 + $0x28] sm:$0xff] }
 0x674   :  { %2479 = vrcp.f32 %v484_v1 }
 0x67e   :  { %v2480_v3 = vpop.eup %2479 }
 0x67f   :  { %v488_v7 = vmul.f32 %v2480_v3, %v393_v47 }
 0x6e2   :  { %v491_v4 = vpop.permute.xlu0 %490 }
 0x6e3   :  { %v493_v5 = vmul.f32 %v2480_v3, %v491_v4 }
 0x6e5   :  { %495 = vrot.lane.b32.xlu1 %v493_v5, %s2592_s3 }
 0x757   :  { %v496_v9 = vpop.permute.xlu1 %495 }
 0x758   :  { %v498_v12 = vadd.f32 %v496_v9, %v488_v7 }
 0x75a   :  { %2481 = vtanh.f32 %v498_v12 }
 0x764   :  { %v2482_v17 = vpop.eup %2481 }
 0x765   :  { %501 = vrot.lane.b32.xlu0 %v2482_v17, %s2592_s3  ;;  %v1050_v17 = vld [vmem:[%s3034_s4] sm:$0xff] }
 0x7d7   :  { %v502_v18 = vpop.permute.xlu0 %501 }
 0x7d8   :  { %v504_v19 = vmul.f32 %v2480_v3, %v502_v18  ;;  %v1051_v18 = vld [vmem:[%s3034_s4 + $0x8] sm:$0xff] }
 0x7da   :  { %506 = vrot.lane.b32.xlu1 %v504_v19, %s2593_s24  ;;  %v2423_v19 = vpack.c.bf16 %v1051_v18, %v1050_v17 }
 0x84c   :  { %v507_v28 = vpop.permute.xlu1 %506 }
 0x84d   :  { %510 = vst.msk [vmem:[#allocation3 + $0x10] sm:$0xff] %vm193_vm7, %v507_v28  ;;  %2265 = vmatmul.mubr.msk.f32.vlgmr.msra.gmra.mrb[8].mxu0 %vm193_vm7, %v507_v28 }
 0x84e   :  { %2416 = vmatpush3.bf16.msra.mxu0 %v2664_v8  ;;  %2282 = vmatprep.mubr.msk.f32.mxu0 %vm2589_vm4, %v2590_v6 }
 0x84f   :  { %2280 = vmatprep.subr.mxu0 %v2590_v6 }
 0x852   :  { %2281 = vmatpush3.msk.msra.mxu0 %vm197_vm5, %v2675_v10 }
 0x853   :  { %2420 = vmatprep.subr.bf16.mxu0 %v2588_v2 }
 0x854   :  { %v1044_v27 = vld [vmem:[#allocation3 + $0x10] sm:$0xff] }
 0x920   :  { %v581_v29 = vpop.f32.mrb[8].mxu0 }
 0x921   :  { %v585_v30 = vadd.f32 %v581_v29, %v512_v11  ;;  %v2266_v31 = vpop.f32.mrb[9].mxu0 }
 0x923   :  { %2483 = vtanh.f32 %v585_v30  ;;  %v2075_v33 = vmul.f32 -1.442695, %v585_v30  ;;  %v827_v30 = vld [vmem:[#allocation2 + $0x30] sm:$0xff] }
 0x925   :  { %2485 = vpow2.f32 %v2075_v33 }
 0x92d   :  { %v2484_v32 = vpop.eup %2483 }
 0x92e   :  { %595 = vrot.lane.b32.xlu0 %v2484_v32, %s2591_s23 }
 0x92f   :  { %v2486_v34 = vpop.eup %2485 }
 0x930   :  { %v589_v35 = vadd.f32 1.0, %v2486_v34  ;;  %v2835_v34 = vld [vmem:[%s3035_s6] ss:$0 sm:$0xff] }
 0x932   :  { %2487 = vrcp.f32 %v589_v35 }
 0x93c   :  { %v2488_v36 = vpop.eup %2487 }
 0x93d   :  { %v593_v39 = vmul.f32 %v2488_v36, %v498_v12 }
 0x9a0   :  { %v596_v37 = vpop.permute.xlu0 %595 }
 0x9a1   :  { %v598_v38 = vmul.f32 %v2488_v36, %v596_v37 }
 0x9a3   :  { %600 = vrot.lane.b32.xlu1 %v598_v38, %s2592_s3 }
 0xa15   :  { %v601_v40 = vpop.permute.xlu1 %600 }
 0xa16   :  { %v603_v41 = vadd.f32 %v601_v40, %v593_v39 }
 0xa18   :  { %2489 = vtanh.f32 %v603_v41 }
 0xa22   :  { %v2490_v42 = vpop.eup %2489 }
 0xa23   :  { %606 = vrot.lane.b32.xlu0 %v2490_v42, %s2592_s3 }
 0xa95   :  { %v607_v43 = vpop.permute.xlu0 %606 }
 0xa96   :  { %v609_v44 = vmul.f32 %v2488_v36, %v607_v43 }
 0xa98   :  { %611 = vrot.lane.b32.xlu1 %v609_v44, %s2593_s24 }
 0xb0a   :  { %v612_v45 = vpop.permute.xlu1 %611 }
 0xb0b   :  { %615 = vst.msk [vmem:[#allocation3 + $0x18] sm:$0xff] %vm193_vm7, %v612_v45  ;;  %2274 = vmatmul.mubr.msk.f32.vlgmr.msra.gmra.mrb[6].mxu1 %vm193_vm7, %v612_v45 }
 0xb0c   :  { %2419 = vmatpush3.bf16.msra.mxu1 %v2664_v8  ;;  %2291 = vmatprep.mubr.msk.f32.mxu1 %vm2589_vm4, %v2590_v6 }
 0xb0d   :  { %2289 = vmatprep.subr.mxu1 %v2590_v6 }
 0xb10   :  { %2290 = vmatpush3.msk.msra.mxu1 %vm197_vm5, %v2675_v10 }
 0xb11   :  { %2424 = vmatprep.subr.bf16.mxu1 %v2423_v19 }
 0xb12   :  { %v1045_v28 = vld [vmem:[#allocation3 + $0x18] sm:$0xff] }
 0xbde   :  { %v686_v47 = vpop.f32.mrb[6].mxu1 }
 0xbdf   :  { %v690_v48 = vadd.f32 %v686_v47, %v617_v46  ;;  %v2275_v49 = vpop.f32.mrb[7].mxu1 }
 0xbe1   :  { %2491 = vtanh.f32 %v690_v48  ;;  %v2078_v51 = vmul.f32 -1.442695, %v690_v48 }
 0xbe3   :  { %2493 = vpow2.f32 %v2078_v51 }
 0xbeb   :  { %v2492_v50 = vpop.eup %2491 }
 0xbec   :  { %700 = vrot.lane.b32.xlu0 %v2492_v50, %s2591_s23 }
 0xbed   :  { %v2494_v52 = vpop.eup %2493 }
 0xbee   :  { %v694_v53 = vadd.f32 1.0, %v2494_v52 }
 0xbf0   :  { %2495 = vrcp.f32 %v694_v53 }
 0xbfa   :  { %v2496_v54 = vpop.eup %2495 }
 0xbfb   :  { %v698_v57 = vmul.f32 %v2496_v54, %v603_v41 }
 0xc5e   :  { %v701_v55 = vpop.permute.xlu0 %700 }
 0xc5f   :  { %v703_v56 = vmul.f32 %v2496_v54, %v701_v55 }
 0xc61   :  { %705 = vrot.lane.b32.xlu1 %v703_v56, %s2592_s3 }
 0xcd3   :  { %v706_v58 = vpop.permute.xlu1 %705 }
 0xcd4   :  { %v708_v59 = vadd.f32 %v706_v58, %v698_v57  ;;  %v1200_v58 = vld [vmem:[%s3036_s5] sm:$0xff] }
 0xcd6   :  { %2497 = vtanh.f32 %v708_v59 }
 0xce0   :  { %v2498_v60 = vpop.eup %2497 }
 0xce1   :  { %711 = vrot.lane.b32.xlu0 %v2498_v60, %s2592_s3 }
 0xd53   :  { %v712_v61 = vpop.permute.xlu0 %711 }
 0xd54   :  { %v714_v62 = vmul.f32 %v2496_v54, %v712_v61  ;;  %v2869_v61 = vld [vmem:[%s3036_s5 + $0x10] sm:$0xf] }
 0xd56   :  { %716 = vrot.lane.b32.xlu1 %v714_v62, %s2593_s24 }
 0xdc8   :  { %v717_v63 = vpop.permute.xlu1 %716 }
 0xdc9   :  { %720 = vst.msk [vmem:[#allocation3 + $0x20] sm:$0xff] %vm193_vm7, %v717_v63  ;;  %2283 = vmatmul.mubr.msk.f32.vlgmr.msra.gmra.mrb[10].mxu0 %vm193_vm7, %v717_v63 }
 0xdca   :  { %2422 = vmatpush3.bf16.msra.mxu0 %v2664_v8  ;;  %2300 = vmatprep.mubr.msk.f32.mxu0 %vm2589_vm4, %v2590_v6 }
 0xdcb   :  { %2298 = vmatprep.subr.mxu0 %v2590_v6 }
 0xdce   :  { %2299 = vmatpush3.msk.msra.mxu0 %vm197_vm5, %v2675_v10 }
 0xdcf   :  { %2427 = vmatprep.subr.bf16.mxu0 %v2588_v2 }
 0xdd0   :  { %v1046_v11 = vld [vmem:[#allocation3 + $0x20] sm:$0xff] }
 0xe9c   :  { %v791_v1 = vpop.f32.mrb[10].mxu0 }
 0xe9d   :  { %v795_v3 = vadd.f32 %v791_v1, %v722_v0  ;;  %v2284_v4 = vpop.f32.mrb[11].mxu0 }
 0xe9f   :  { %2499 = vtanh.f32 %v795_v3  ;;  %v2081_v7 = vmul.f32 -1.442695, %v795_v3 }
 0xea1   :  { %2501 = vpow2.f32 %v2081_v7 }
 0xea9   :  { %v2500_v5 = vpop.eup %2499 }
 0xeaa   :  { %805 = vrot.lane.b32.xlu0 %v2500_v5, %s2591_s23 }
 0xeab   :  { %v2502_v8 = vpop.eup %2501 }
 0xeac   :  { %v799_v9 = vadd.f32 1.0, %v2502_v8 }
 0xeae   :  { %2503 = vrcp.f32 %v799_v9 }
 0xeb8   :  { %v2504_v12 = vpop.eup %2503 }
 0xeb9   :  { %v803_v10 = vmul.f32 %v2504_v12, %v708_v59  ;;  %v1201_v59 = vld [vmem:[%s3036_s5 + $0x8] sm:$0xff] }
 0xeba   :  { %v2862_v60 = vpack.c.bf16 %v1201_v59, %v1200_v58 }
 0xf1c   :  { %v806_v13 = vpop.permute.xlu0 %805 }
 0xf1d   :  { %v808_v14 = vmul.f32 %v2504_v12, %v806_v13 }
 0xf1f   :  { %810 = vrot.lane.b32.xlu1 %v808_v14, %s2592_s3 }
 0xf91   :  { %v811_v15 = vpop.permute.xlu1 %810 }
 0xf92   :  { %v2807_v16 = vadd.f32 %v811_v15, %v803_v10 }
 0xf94   :  { %2505 = vtanh.f32 %v2807_v16 }
 0xf9e   :  { %v2506_v20 = vpop.eup %2505 }
 0xf9f   :  { %816 = vrot.lane.b32.xlu0 %v2506_v20, %s2592_s3 }
0x1011   :  { %v817_v21 = vpop.permute.xlu0 %816 }
0x1012   :  { %v819_v22 = vmul.f32 %v2504_v12, %v817_v21 }
0x1014   :  { %821 = vrot.lane.b32.xlu1 %v819_v22, %s2593_s24 }
0x1086   :  { %v822_v23 = vpop.permute.xlu1 %821 }
0x1087   :  { %825 = vst.msk [vmem:[#allocation3 + $0x28] sm:$0xff] %vm193_vm7, %v822_v23  ;;  %2292 = vmatmul.mubr.msk.f32.vlgmr.msra.gmra.mrb[8].mxu1 %vm193_vm7, %v822_v23 }
0x1088   :  { %2426 = vmatpush3.bf16.msra.mxu1 %v2423_v19  ;;  %2309 = vmatprep.mubr.msk.f32.mxu1 %vm193_vm7, %v1042_v25 }
0x1089   :  { %2307 = vmatprep.subr.msk.mxu1 %vm197_vm5, %v1052_v24 }
0x108c   :  { %2308 = vmatpush3.msk.msra.mxu1 %vm197_vm5, %v1052_v24 }
0x108d   :  { %2310 = vmatmul.mubr.msk.f32.vlgmr.msra.gmra.mrb[10].mxu1 %vm193_vm7, %v1043_v26  ;;  %2436 = vmatprep.subr.bf16.mxu1 %v2588_v2 }
0x108e   :  { %2312 = vmatprep.mubr.msk.f32.mxu1 %vm193_vm7, %v1044_v27  ;;  %v1047_v29 = vld [vmem:[#allocation3 + $0x28] sm:$0xff]  ;;  %2438 = vmatpush3.bf16.msra.mxu1 %v2862_v60 }
0x108f   :  { %2352 = vmatprep.subr.mxu1 %v2590_v6 }
0x1091   :  { %2313 = vmatmul.mubr.msk.f32.gmra.mrb[12].mxu1 %vm193_vm7, %v1045_v28 }
0x1092   :  { %2315 = vmatprep.mubr.msk.f32.mxu1 %vm193_vm7, %v1046_v11  ;;  %2353 = vmatpush3.msk.msra.mxu1 %vm197_vm5, %v2869_v61 }
0x1093   :  { %2442 = vmatprep.subr.bf16.mxu1 %v2588_v2 }
0x1095   :  { %2316 = vmatmul.mubr.msk.f32.gmra.mrb[14].mxu1 %vm193_vm7, %v1047_v29 }
0x115a   :  { %v896_v31 = vpop.f32.mrb[8].mxu1 }
0x115b   :  { %v900_v32 = vadd.f32 %v896_v31, %v827_v30  ;;  %v2293_v33 = vpop.f32.mrb[9].mxu1 }
0x115d   :  { %2507 = vtanh.f32 %v900_v32  ;;  %v2084_v48 = vmul.f32 -1.442695, %v900_v32 }
0x115f   :  { %2509 = vpow2.f32 %v2084_v48 }
0x1160   :  { %v2311_v35 = vpop.f32.mrb[10].mxu1 }
0x1161   :  { %v1159_v36 = vadd.f32 %v2311_v35, %v2835_v34  ;;  %v1153_v37 = vpop.f32.mrb[11].mxu1 }
0x1162   :  { %v1154_v38 = vadd.f32 %v2835_v34, %v1153_v37 }
0x1163   :  { %1193 = vst.msk [vmem:[#allocation2 + $0x8] sm:$0xff] %vm180_vm6, %v1159_v36 }
0x1164   :  { %1192 = vst.msk [vmem:[#allocation2] sm:$0xff] %vm180_vm6, %v1154_v38  ;;  %v2314_v39 = vpop.f32.mrb[12].mxu1 }
0x1165   :  { %v1169_v40 = vadd.f32 %v2314_v39, %v2835_v34  ;;  %v1163_v41 = vpop.f32.mrb[13].mxu1  ;;  %v932_v39 = vld [vmem:[#allocation2 + $0x38] sm:$0xff] }
0x1166   :  { %v1164_v42 = vadd.f32 %v2835_v34, %v1163_v41 }
0x1167   :  { %v2508_v43 = vpop.eup %2507  ;;  %1195 = vst.msk [vmem:[#allocation2 + $0x18] sm:$0xff] %vm180_vm6, %v1169_v40 }
0x1168   :  { %1194 = vst.msk [vmem:[#allocation2 + $0x10] sm:$0xff] %vm180_vm6, %v1164_v42  ;;  %v2317_v44 = vpop.f32.mrb[14].mxu1  ;;  %910 = vrot.lane.b32.xlu0 %v2508_v43, %s2591_s23 }
0x1169   :  { %v1179_v45 = vadd.f32 %v2317_v44, %v2835_v34  ;;  %v1173_v46 = vpop.f32.mrb[15].mxu1  ;;  %v2510_v49 = vpop.eup %2509 }
0x116a   :  { %v1174_v47 = vadd.f32 %v2835_v34, %v1173_v46  ;;  %v904_v50 = vadd.f32 1.0, %v2510_v49  ;;  %v1307_v25 = vld [vmem:[#allocation2 + $0x8] sm:$0xff] }
0x116b   :  { %1197 = vst.msk [vmem:[#allocation2 + $0x28] sm:$0xff] %vm180_vm6, %v1179_v45  ;;  %v1203_v5 = vld [vmem:[#allocation2] sm:$0xff] }
0x116c   :  { %1196 = vst.msk [vmem:[#allocation2 + $0x20] sm:$0xff] %vm180_vm6, %v1174_v47  ;;  %2511 = vrcp.f32 %v904_v50 }
0x1176   :  { %v2512_v51 = vpop.eup %2511 }
0x1177   :  { %v908_v54 = vmul.f32 %v2512_v51, %v2807_v16 }
0x11da   :  { %v911_v52 = vpop.permute.xlu0 %910 }
0x11db   :  { %v913_v53 = vmul.f32 %v2512_v51, %v911_v52 }
0x11dd   :  { %915 = vrot.lane.b32.xlu1 %v913_v53, %s2592_s3 }
0x124f   :  { %v916_v55 = vpop.permute.xlu1 %915 }
0x1250   :  { %v2852_v56 = vadd.f32 %v916_v55, %v908_v54 }
0x1252   :  { %2513 = vtanh.f32 %v2852_v56 }
0x125c   :  { %v2514_v57 = vpop.eup %2513 }
0x125d   :  { %921 = vrot.lane.b32.xlu0 %v2514_v57, %s2592_s3 }
0x12cf   :  { %v922_v62 = vpop.permute.xlu0 %921 }
0x12d0   :  { %v924_v63 = vmul.f32 %v2512_v51, %v922_v62 }
0x12d2   :  { %926 = vrot.lane.b32.xlu1 %v924_v63, %s2593_s24 }
0x1344   :  { %v927_v0 = vpop.permute.xlu1 %926 }
0x1345   :  { %930 = vst.msk [vmem:[#allocation3 + $0x30] sm:$0xff] %vm193_vm7, %v927_v0  ;;  %2301 = vmatmul.mubr.msk.f32.vlgmr.msra.gmra.mrb[12].mxu0 %vm193_vm7, %v927_v0 }
0x1346   :  { %2429 = vmatpush3.bf16.msra.mxu0 %v2862_v60  ;;  %2327 = vmatprep.mubr.msk.f32.mxu0 %vm2589_vm4, %v2590_v6 }
0x1347   :  { %2325 = vmatprep.subr.mxu0 %v2590_v6 }
0x134a   :  { %2326 = vmatpush3.msk.msra.mxu0 %vm197_vm5, %v2869_v61 }
0x134b   :  { %2328 = vmatmul.mubr.f32.vlgmr.msra.gmra.mrb[14].mxu0 %v2590_v6  ;;  %2430 = vmatprep.subr.bf16.mxu0 %v2588_v2 }
0x134c   :  { %v1048_v1 = vld [vmem:[#allocation3 + $0x30] sm:$0xff]  ;;  %2432 = vmatpush3.bf16.msra.mxu0 %v2862_v60  ;;  %2336 = vmatprep.mubr.msk.f32.mxu0 %vm2589_vm4, %v2590_v6 }
0x134d   :  { %2318 = vmatprep.mubr.msk.f32.mxu1 %vm193_vm7, %v1048_v1  ;;  %2334 = vmatprep.subr.mxu0 %v2590_v6 }
0x1350   :  { %2335 = vmatpush3.msk.msra.mxu0 %vm197_vm5, %v2869_v61 }
0x1351   :  { %2433 = vmatprep.subr.bf16.mxu0 %v2588_v2 }
0x1418   :  { %v1001_v3 = vpop.f32.mrb[12].mxu0 }
0x1419   :  { %v2302_v4 = vpop.f32.mrb[13].mxu0  ;;  %v1005_v40 = vadd.f32 %v1001_v3, %v932_v39  ;;  %v1619_v39 = vld [vmem:[#allocation2 + $0x20] sm:$0xff] }
0x141b   :  { %v2087_v43 = vmul.f32 -1.442695, %v1005_v40 }
0x141e   :  { %v1273_v7 = vpop.f32.mrb[14].mxu0 }
0x141f   :  { %v1277_v8 = vadd.f32 %v1273_v7, %v1203_v5  ;;  %v2329_v9 = vpop.f32.mrb[15].mxu0 }
0x1421   :  { %2515 = vtanh.f32 %v1277_v8  ;;  %v2099_v13 = vmul.f32 -1.442695, %v1277_v8 }
0x1423   :  { %2517 = vpow2.f32 %v2099_v13 }
0x142b   :  { %v2516_v12 = vpop.eup %2515 }
0x142c   :  { %1287 = vrot.lane.b32.xlu0 %v2516_v12, %s2591_s23 }
0x142d   :  { %v2518_v14 = vpop.eup %2517 }
0x142e   :  { %v1281_v10 = vadd.f32 1.0, %v2518_v14 }
0x1430   :  { %2519 = vrcp.f32 %v1281_v10 }
0x143a   :  { %v2520_v15 = vpop.eup %2519 }
0x143b   :  { %v1285_v18 = vmul.f32 0.0, %v2520_v15 }
0x149e   :  { %v1288_v16 = vpop.permute.xlu0 %1287 }
0x149f   :  { %v1290_v17 = vmul.f32 %v2520_v15, %v1288_v16 }
0x14a1   :  { %1292 = vrot.lane.b32.xlu1 %v1290_v17, %s2592_s3 }
0x1513   :  { %v1293_v19 = vpop.permute.xlu1 %1292 }
0x1514   :  { %v1295_v20 = vadd.f32 %v1293_v19, %v1285_v18 }
0x1516   :  { %2521 = vtanh.f32 %v1295_v20 }
0x1520   :  { %v2522_v21 = vpop.eup %2521 }
0x1521   :  { %1298 = vrot.lane.b32.xlu0 %v2522_v21, %s2592_s3 }
0x1593   :  { %v1299_v22 = vpop.permute.xlu0 %1298 }
0x1594   :  { %v1301_v23 = vmul.f32 %v2520_v15, %v1299_v22 }
0x1596   :  { %1303 = vrot.lane.b32.xlu1 %v1301_v23, %s2593_s24 }
0x1608   :  { %v1304_v24 = vpop.permute.xlu1 %1303 }
0x1609   :  { %1306 = vst.msk [vmem:[%s3037_s7] sm:$0xff] %vm193_vm7, %v1304_v24  ;;  %2337 = vmatmul.mubr.msk.f32.vlgmr.msra.gmra.mrb[16].mxu0 %vm193_vm7, %v1304_v24 }
0x160a   :  { %2435 = vmatpush3.bf16.msra.mxu0 %v2862_v60  ;;  %2345 = vmatprep.mubr.msk.f32.mxu0 %vm2589_vm4, %v2590_v6 }
0x160b   :  { %2343 = vmatprep.subr.mxu0 %v2590_v6 }
0x160e   :  { %2344 = vmatpush3.msk.msra.mxu0 %vm197_vm5, %v2869_v61 }
0x160f   :  { %2439 = vmatprep.subr.bf16.mxu0 %v2588_v2 }
0x16dc   :  { %v1376_v26 = vpop.f32.mrb[16].mxu0 }
0x16dd   :  { %v1380_v27 = vadd.f32 %v1376_v26, %v1307_v25  ;;  %v2338_v28 = vpop.f32.mrb[17].mxu0 }
0x16df   :  { %2523 = vtanh.f32 %v1380_v27  ;;  %v2102_v29 = vmul.f32 -1.442695, %v1380_v27 }
0x16e1   :  { %2525 = vpow2.f32 %v2102_v29 }
0x16e9   :  { %v2524_v11 = vpop.eup %2523 }
0x16ea   :  { %1390 = vrot.lane.b32.xlu0 %v2524_v11, %s2591_s23 }
0x16eb   :  { %v2526_v30 = vpop.eup %2525 }
0x16ec   :  { %v1384_v31 = vadd.f32 1.0, %v2526_v30 }
0x16ee   :  { %2527 = vrcp.f32 %v1384_v31 }
0x16f8   :  { %v2528_v32 = vpop.eup %2527 }
0x16f9   :  { %v1388_v36 = vmul.f32 %v2528_v32, %v1295_v20 }
0x175c   :  { %v1391_v33 = vpop.permute.xlu0 %1390 }
0x175d   :  { %v1393_v35 = vmul.f32 %v2528_v32, %v1391_v33 }
0x175f   :  { %1395 = vrot.lane.b32.xlu1 %v1393_v35, %s2592_s3 }
0x17d1   :  { %v1396_v37 = vpop.permute.xlu1 %1395 }
0x17d2   :  { %v1398_v38 = vadd.f32 %v1396_v37, %v1388_v36 }
0x17d4   :  { %2529 = vtanh.f32 %v1398_v38 }
0x17d5   :  { %2531 = vtanh.f32 %v1005_v40 }
0x17d6   :  { %2533 = vpow2.f32 %v2087_v43 }
0x17de   :  { %v2530_v41 = vpop.eup %2529 }
0x17df   :  { %1401 = vrot.lane.b32.xlu0 %v2530_v41, %s2592_s3  ;;  %v2532_v42 = vpop.eup %2531 }
0x17e0   :  { %v2534_v44 = vpop.eup %2533 }
0x17e1   :  { %v1009_v45 = vadd.f32 1.0, %v2534_v44 }
0x17e3   :  { %1015 = vrot.lane.b32.xlu0 %v2532_v42, %s2591_s23  ;;  %2535 = vrcp.f32 %v1009_v45 }
0x17ed   :  { %v2536_v48 = vpop.eup %2535 }
0x17ee   :  { %v1013_v52 = vmul.f32 %v2536_v48, %v2852_v56  ;;  %v1411_v56 = vld [vmem:[#allocation2 + $0x10] sm:$0xff] }
0x1851   :  { %v1402_v46 = vpop.permute.xlu0 %1401 }
0x1852   :  { %v1404_v47 = vmul.f32 %v2528_v32, %v1402_v46 }
0x1854   :  { %1406 = vrot.lane.b32.xlu1 %v1404_v47, %s2593_s24 }
0x1855   :  { %v1016_v49 = vpop.permute.xlu0 %1015 }
0x1856   :  { %v1018_v50 = vmul.f32 %v2536_v48, %v1016_v49 }
0x1858   :  { %1020 = vrot.lane.b32.xlu0 %v1018_v50, %s2592_s3 }
0x18c6   :  { %v1407_v51 = vpop.permute.xlu1 %1406 }
0x18c7   :  { %2103 = vst.msk [vmem:[%s3037_s7 + $0x8] sm:$0xff] %vm193_vm7, %v1407_v51  ;;  %2346 = vmatmul.mubr.msk.f32.vlgmr.msra.gmra.mrb[18].mxu0 %vm193_vm7, %v1407_v51 }
0x18c8   :  { %2441 = vmatpush3.bf16.msra.mxu0 %v2862_v60  ;;  %2363 = vmatprep.mubr.msk.f32.mxu0 %vm2589_vm4, %v2590_v6 }
0x18c9   :  { %2361 = vmatprep.subr.mxu0 %v2590_v6 }
0x18ca   :  { %v1021_v53 = vpop.permute.xlu0 %1020 }
0x18cb   :  { %v2925_v54 = vadd.f32 %v1021_v53, %v1013_v52 }
0x18cc   :  { %2362 = vmatpush3.msk.msra.mxu0 %vm197_vm5, %v2869_v61 }
0x18cd   :  { %2537 = vtanh.f32 %v2925_v54  ;;  %2445 = vmatprep.subr.bf16.mxu0 %v2588_v2 }
0x18d7   :  { %v2538_v55 = vpop.eup %2537 }
0x18d8   :  { %1026 = vrot.lane.b32.xlu0 %v2538_v55, %s2592_s3 }
0x194a   :  { %v1027_v57 = vpop.permute.xlu0 %1026 }
0x194b   :  { %v1029_v58 = vmul.f32 %v2536_v48, %v1027_v57 }
0x194d   :  { %1031 = vrot.lane.b32.xlu0 %v1029_v58, %s2593_s24 }
0x199a   :  { %v1480_v59 = vpop.f32.mrb[18].mxu0 }
0x199b   :  { %v1484_v62 = vadd.f32 %v1480_v59, %v1411_v56  ;;  %v2347_v63 = vpop.f32.mrb[19].mxu0  ;;  %v1723_v56 = vld [vmem:[#allocation2 + $0x28] sm:$0xff] }
0x199d   :  { %2539 = vtanh.f32 %v1484_v62  ;;  %v2106_v4 = vmul.f32 -1.442695, %v1484_v62 }
0x199f   :  { %2541 = vpow2.f32 %v2106_v4 }
0x19a7   :  { %v2540_v0 = vpop.eup %2539 }
0x19a8   :  { %1494 = vrot.lane.b32.xlu1 %v2540_v0, %s2591_s23 }
0x19a9   :  { %v2542_v5 = vpop.eup %2541 }
0x19aa   :  { %v1488_v7 = vadd.f32 1.0, %v2542_v5 }
0x19ac   :  { %2543 = vrcp.f32 %v1488_v7 }
0x19b6   :  { %v2544_v8 = vpop.eup %2543 }
0x19b7   :  { %v1492_v13 = vmul.f32 %v2544_v8, %v1398_v38 }
0x19bf   :  { %v1032_v1 = vpop.permute.xlu0 %1031 }
0x19c0   :  { %1035 = vst.msk [vmem:[#allocation3 + $0x38] sm:$0xff] %vm193_vm7, %v1032_v1  ;;  %1036 = vst.msk [vmem:[%s3038_s8] sm:$0xff] %vm193_vm7, %v1032_v1 }
0x19c7   :  { %v1049_v3 = vld [vmem:[#allocation3 + $0x38] sm:$0xff] }
0x19c8   :  { %2319 = vmatmul.mubr.msk.f32.gmra.mrb[16].mxu1 %vm193_vm7, %v1049_v3 }
0x19c9   :  { %2354 = vmatprep.mubr.msk.f32.mxu1 %vm2589_vm4, %v2590_v6 }
0x1a1a   :  { %v1495_v9 = vpop.permute.xlu1 %1494 }
0x1a1b   :  { %v1497_v12 = vmul.f32 %v2544_v8, %v1495_v9 }
0x1a1d   :  { %1499 = vrot.lane.b32.xlu1 %v1497_v12, %s2592_s3 }
0x1a8f   :  { %v1500_v14 = vpop.permute.xlu1 %1499 }
0x1a90   :  { %v1502_v10 = vadd.f32 %v1500_v14, %v1492_v13 }
0x1a92   :  { %2545 = vtanh.f32 %v1502_v10 }
0x1a9b   :  { %v2320_v15 = vpop.f32.mrb[16].mxu1 }
0x1a9c   :  { %v2546_v16 = vpop.eup %2545  ;;  %v1189_v17 = vadd.f32 %v2320_v15, %v2835_v34  ;;  %v1183_v18 = vpop.f32.mrb[17].mxu1 }
0x1a9d   :  { %v1184_v19 = vadd.f32 %v2835_v34, %v1183_v18  ;;  %1505 = vrot.lane.b32.xlu1 %v2546_v16, %s2592_s3  ;;  %v1515_v34 = vld [vmem:[#allocation2 + $0x18] sm:$0xff] }
0x1a9e   :  { %1199 = vst.msk [vmem:[#allocation2 + $0x38] sm:$0xff] %vm180_vm6, %v1189_v17 }
0x1a9f   :  { %1198 = vst.msk [vmem:[#allocation2 + $0x30] sm:$0xff] %vm180_vm6, %v1184_v19 }
0x1b0f   :  { %v1506_v20 = vpop.permute.xlu1 %1505 }
0x1b10   :  { %v1508_v21 = vmul.f32 %v2544_v8, %v1506_v20 }
0x1b12   :  { %1510 = vrot.lane.b32.xlu1 %v1508_v21, %s2593_s24 }
0x1b84   :  { %v1511_v22 = vpop.permute.xlu1 %1510 }
0x1b85   :  { %2107 = vst.msk [vmem:[%s3037_s7 + $0x10] sm:$0xff] %vm193_vm7, %v1511_v22  ;;  %2355 = vmatmul.mubr.msk.f32.vlgmr.msra.gmra.mrb[18].mxu1 %vm193_vm7, %v1511_v22 }
0x1b86   :  { %2444 = vmatpush3.bf16.msra.mxu1 %v2862_v60  ;;  %2372 = vmatprep.mubr.msk.f32.mxu1 %vm2589_vm4, %v2590_v6 }
0x1b87   :  { %2370 = vmatprep.subr.mxu1 %v2590_v6 }
0x1b8a   :  { %2371 = vmatpush3.msk.msra.mxu1 %vm197_vm5, %v2869_v61 }
0x1b8b   :  { %2448 = vmatprep.subr.bf16.mxu1 %v2588_v2 }
0x1c58   :  { %v1584_v23 = vpop.f32.mrb[18].mxu1 }
0x1c59   :  { %v1588_v24 = vadd.f32 %v1584_v23, %v1515_v34  ;;  %v2356_v25 = vpop.f32.mrb[19].mxu1 }
0x1c5b   :  { %2547 = vtanh.f32 %v1588_v24  ;;  %v2110_v27 = vmul.f32 -1.442695, %v1588_v24 }
0x1c5d   :  { %2549 = vpow2.f32 %v2110_v27 }
0x1c65   :  { %v2548_v26 = vpop.eup %2547 }
0x1c66   :  { %1598 = vrot.lane.b32.xlu0 %v2548_v26, %s2591_s23 }
0x1c67   :  { %v2550_v28 = vpop.eup %2549 }
0x1c68   :  { %v1592_v11 = vadd.f32 1.0, %v2550_v28 }
0x1c6a   :  { %2551 = vrcp.f32 %v1592_v11 }
0x1c74   :  { %v2552_v29 = vpop.eup %2551 }
0x1c75   :  { %v1596_v32 = vmul.f32 %v2552_v29, %v1502_v10  ;;  %v1827_v10 = vld [vmem:[#allocation2 + $0x30] sm:$0xff] }
0x1cd8   :  { %v1599_v30 = vpop.permute.xlu0 %1598 }
0x1cd9   :  { %v1601_v31 = vmul.f32 %v2552_v29, %v1599_v30  ;;  %v1931_v30 = vld [vmem:[#allocation2 + $0x38] sm:$0xff] }
0x1cdb   :  { %1603 = vrot.lane.b32.xlu1 %v1601_v31, %s2592_s3 }
0x1d4d   :  { %v1604_v2 = vpop.permute.xlu1 %1603 }
0x1d4e   :  { %v1606_v33 = vadd.f32 %v1604_v2, %v1596_v32 }
0x1d50   :  { %2553 = vtanh.f32 %v1606_v33 }
0x1d5a   :  { %v2554_v35 = vpop.eup %2553 }
0x1d5b   :  { %1609 = vrot.lane.b32.xlu0 %v2554_v35, %s2592_s3 }
0x1dcd   :  { %v1610_v36 = vpop.permute.xlu0 %1609 }
0x1dce   :  { %v1612_v37 = vmul.f32 %v2552_v29, %v1610_v36 }
0x1dd0   :  { %1614 = vrot.lane.b32.xlu1 %v1612_v37, %s2593_s24 }
0x1e42   :  { %v1615_v38 = vpop.permute.xlu1 %1614 }
0x1e43   :  { %2111 = vst.msk [vmem:[%s3037_s7 + $0x18] sm:$0xff] %vm193_vm7, %v1615_v38  ;;  %2364 = vmatmul.mubr.msk.f32.vlgmr.msra.gmra.mrb[20].mxu0 %vm193_vm7, %v1615_v38 }
0x1e44   :  { %2447 = vmatpush3.bf16.msra.mxu0 %v2862_v60  ;;  %2381 = vmatprep.mubr.msk.f32.mxu0 %vm2589_vm4, %v2590_v6 }
0x1e45   :  { %2379 = vmatprep.subr.mxu0 %v2590_v6 }
0x1e48   :  { %2380 = vmatpush3.msk.msra.mxu0 %vm197_vm5, %v2869_v61 }
0x1f16   :  { %v1688_v40 = vpop.f32.mrb[20].mxu0 }
0x1f17   :  { %v1692_v41 = vadd.f32 %v1688_v40, %v1619_v39  ;;  %v2365_v42 = vpop.f32.mrb[21].mxu0 }
0x1f19   :  { %2555 = vtanh.f32 %v1692_v41  ;;  %v2114_v44 = vmul.f32 -1.442695, %v1692_v41 }
0x1f1b   :  { %2557 = vpow2.f32 %v2114_v44 }
0x1f23   :  { %v2556_v43 = vpop.eup %2555 }
0x1f24   :  { %1702 = vrot.lane.b32.xlu0 %v2556_v43, %s2591_s23 }
0x1f25   :  { %v2558_v45 = vpop.eup %2557 }
0x1f26   :  { %v1696_v46 = vadd.f32 1.0, %v2558_v45 }
0x1f28   :  { %2559 = vrcp.f32 %v1696_v46 }
0x1f32   :  { %v2560_v47 = vpop.eup %2559 }
0x1f33   :  { %v1700_v50 = vmul.f32 %v2560_v47, %v1606_v33 }
0x1f96   :  { %v1703_v48 = vpop.permute.xlu0 %1702 }
0x1f97   :  { %v1705_v49 = vmul.f32 %v2560_v47, %v1703_v48 }
0x1f99   :  { %1707 = vrot.lane.b32.xlu1 %v1705_v49, %s2592_s3 }
0x200b   :  { %v1708_v51 = vpop.permute.xlu1 %1707 }
0x200c   :  { %v1710_v52 = vadd.f32 %v1708_v51, %v1700_v50 }
0x200e   :  { %2561 = vtanh.f32 %v1710_v52 }
0x2018   :  { %v2562_v53 = vpop.eup %2561 }
0x2019   :  { %1713 = vrot.lane.b32.xlu0 %v2562_v53, %s2592_s3 }
0x208b   :  { %v1714_v55 = vpop.permute.xlu0 %1713 }
0x208c   :  { %v1716_v57 = vmul.f32 %v2560_v47, %v1714_v55 }
0x208e   :  { %1718 = vrot.lane.b32.xlu1 %v1716_v57, %s2593_s24 }
0x2100   :  { %v1719_v58 = vpop.permute.xlu1 %1718 }
0x2101   :  { %2115 = vst.msk [vmem:[%s3037_s7 + $0x20] sm:$0xff] %vm193_vm7, %v1719_v58  ;;  %2373 = vmatmul.mubr.msk.f32.vlgmr.msra.gmra.mrb[20].mxu1 %vm193_vm7, %v1719_v58 }
0x2102   :  { %2450 = vmatpush3.bf16.msra.mxu1 %v2862_v60  ;;  %2390 = vmatprep.mubr.msk.f32.mxu1 %vm2589_vm4, %v2590_v6 }
0x2103   :  { %2388 = vmatprep.subr.mxu1 %v2590_v6 }
0x2106   :  { %2389 = vmatpush3.msk.msra.mxu1 %vm197_vm5, %v2869_v61 }
0x21d4   :  { %v1792_v59 = vpop.f32.mrb[20].mxu1 }
0x21d5   :  { %v1796_v62 = vadd.f32 %v1792_v59, %v1723_v56  ;;  %v2374_v63 = vpop.f32.mrb[21].mxu1 }
0x21d7   :  { %2563 = vtanh.f32 %v1796_v62  ;;  %v2118_v1 = vmul.f32 -1.442695, %v1796_v62 }
0x21d9   :  { %2565 = vpow2.f32 %v2118_v1 }
0x21e1   :  { %v2564_v0 = vpop.eup %2563 }
0x21e2   :  { %1806 = vrot.lane.b32.xlu0 %v2564_v0, %s2591_s23 }
0x21e3   :  { %v2566_v3 = vpop.eup %2565 }
0x21e4   :  { %v1800_v60 = vadd.f32 1.0, %v2566_v3 }
0x21e6   :  { %2567 = vrcp.f32 %v1800_v60 }
0x21f0   :  { %v2568_v4 = vpop.eup %2567 }
0x21f1   :  { %v1804_v6 = vmul.f32 %v2568_v4, %v1710_v52 }
0x2254   :  { %v1807_v5 = vpop.permute.xlu0 %1806 }
0x2255   :  { %v1809_v7 = vmul.f32 %v2568_v4, %v1807_v5 }
0x2257   :  { %1811 = vrot.lane.b32.xlu1 %v1809_v7, %s2592_s3 }
0x22c9   :  { %v1812_v61 = vpop.permute.xlu1 %1811 }
0x22ca   :  { %v1814_v8 = vadd.f32 %v1812_v61, %v1804_v6 }
0x22cc   :  { %2569 = vtanh.f32 %v1814_v8 }
0x22d6   :  { %v2570_v9 = vpop.eup %2569 }
0x22d7   :  { %1817 = vrot.lane.b32.xlu0 %v2570_v9, %s2592_s3 }
0x2349   :  { %v1818_v12 = vpop.permute.xlu0 %1817 }
0x234a   :  { %v1820_v13 = vmul.f32 %v2568_v4, %v1818_v12 }
0x234c   :  { %1822 = vrot.lane.b32.xlu1 %v1820_v13, %s2593_s24 }
0x23be   :  { %v1823_v14 = vpop.permute.xlu1 %1822 }
0x23bf   :  { %2119 = vst.msk [vmem:[%s3037_s7 + $0x28] sm:$0xff] %vm193_vm7, %v1823_v14  ;;  %2382 = vmatmul.mubr.msk.f32.vlgmr.msra.gmra.mrb[22].mxu0 %vm193_vm7, %v1823_v14 }
0x2492   :  { %v1896_v15 = vpop.f32.mrb[22].mxu0 }
0x2493   :  { %v1900_v16 = vadd.f32 %v1896_v15, %v1827_v10  ;;  %v2383_v17 = vpop.f32.mrb[23].mxu0 }
0x2495   :  { %2571 = vtanh.f32 %v1900_v16  ;;  %v2122_v19 = vmul.f32 -1.442695, %v1900_v16 }
0x2497   :  { %2573 = vpow2.f32 %v2122_v19 }
0x249f   :  { %v2572_v18 = vpop.eup %2571 }
0x24a0   :  { %1910 = vrot.lane.b32.xlu0 %v2572_v18, %s2591_s23 }
0x24a1   :  { %v2574_v20 = vpop.eup %2573 }
0x24a2   :  { %v1904_v21 = vadd.f32 1.0, %v2574_v20 }
0x24a4   :  { %2575 = vrcp.f32 %v1904_v21 }
0x24ae   :  { %v2576_v22 = vpop.eup %2575 }
0x24af   :  { %v1908_v24 = vmul.f32 %v2576_v22, %v1814_v8 }
0x2512   :  { %v1911_v34 = vpop.permute.xlu0 %1910 }
0x2513   :  { %v1913_v23 = vmul.f32 %v2576_v22, %v1911_v34 }
0x2515   :  { %1915 = vrot.lane.b32.xlu1 %v1913_v23, %s2592_s3 }
0x2587   :  { %v1916_v25 = vpop.permute.xlu1 %1915 }
0x2588   :  { %v1918_v26 = vadd.f32 %v1916_v25, %v1908_v24 }
0x258a   :  { %2577 = vtanh.f32 %v1918_v26 }
0x2594   :  { %v2578_v27 = vpop.eup %2577 }
0x2595   :  { %1921 = vrot.lane.b32.xlu0 %v2578_v27, %s2592_s3 }
0x2607   :  { %v1922_v28 = vpop.permute.xlu0 %1921 }
0x2608   :  { %v1924_v11 = vmul.f32 %v2576_v22, %v1922_v28 }
0x260a   :  { %1926 = vrot.lane.b32.xlu1 %v1924_v11, %s2593_s24 }
0x267c   :  { %v1927_v29 = vpop.permute.xlu1 %1926 }
0x267d   :  { %2123 = vst.msk [vmem:[%s3037_s7 + $0x30] sm:$0xff] %vm193_vm7, %v1927_v29  ;;  %2391 = vmatmul.mubr.msk.f32.vlgmr.msra.gmra.mrb[22].mxu1 %vm193_vm7, %v1927_v29 }
0x2750   :  { %v2000_v31 = vpop.f32.mrb[22].mxu1 }
0x2751   :  { %v2004_v32 = vadd.f32 %v2000_v31, %v1931_v30  ;;  %v2392_v2 = vpop.f32.mrb[23].mxu1 }
0x2753   :  { %2579 = vtanh.f32 %v2004_v32  ;;  %v2126_v35 = vmul.f32 -1.442695, %v2004_v32 }
0x2755   :  { %2581 = vpow2.f32 %v2126_v35 }
0x275d   :  { %v2580_v33 = vpop.eup %2579 }
0x275e   :  { %2014 = vrot.lane.b32.xlu0 %v2580_v33, %s2591_s23 }
0x275f   :  { %v2582_v36 = vpop.eup %2581 }
0x2760   :  { %v2008_v37 = vadd.f32 1.0, %v2582_v36 }
0x2762   :  { %2583 = vrcp.f32 %v2008_v37 }
0x276c   :  { %v2584_v38 = vpop.eup %2583 }
0x276d   :  { %v2012_v41 = vmul.f32 %v2584_v38, %v1918_v26 }
0x27d0   :  { %v2015_v39 = vpop.permute.xlu0 %2014 }
0x27d1   :  { %v2017_v40 = vmul.f32 %v2584_v38, %v2015_v39 }
0x27d3   :  { %2019 = vrot.lane.b32.xlu1 %v2017_v40, %s2592_s3 }
0x27d7   :  { %1038 = vrot.lane.b32.xlu1 %v2925_v54, %s2594_s19 }
0x2845   :  { %v2020_v42 = vpop.permute.xlu1 %2019 }
0x2846   :  { %v2022_v43 = vadd.f32 %v2020_v42, %v2012_v41 }
0x2848   :  { %2585 = vtanh.f32 %v2022_v43  ;;  %2038 = vrot.lane.b32.xlu1 %v2022_v43, %s2594_s19 }
0x2849   :  { %v1039_v44 = vpop.permute.xlu1 %1038 }
0x284a   :  { %1041 = vst.msk [vmem:[%s3039_s9] sm:$0xff] %vm193_vm7, %v1039_v44 }
0x2852   :  { %v2586_v45 = vpop.eup %2585 }
0x2853   :  { %2025 = vrot.lane.b32.xlu0 %v2586_v45, %s2592_s3 }
0x28ba   :  { %v2039_v46 = vpop.permute.xlu1 %2038 }
0x28bb   :  { %2129 = vst.msk [vmem:[%s3039_s9 + $0x8] sm:$0xff] %vm193_vm7, %v2039_v46 }
0x28c5   :  { %v2026_v54 = vpop.permute.xlu0 %2025 }
0x28c6   :  { %v2028_v47 = vmul.f32 %v2584_v38, %v2026_v54 }
0x28c8   :  { %2030 = vrot.lane.b32.xlu0 %v2028_v47, %s2593_s24 }
0x293a   :  { %v2031_v48 = vpop.permute.xlu0 %2030 }
0x293b   :  { %2127 = vst.msk [vmem:[%s3037_s7 + $0x38] sm:$0xff] %vm193_vm7, %v2031_v48  ;;  %2128 = vst.msk [vmem:[%s3038_s8 + $0x8] sm:$0xff] %vm193_vm7, %v2031_v48 }

</bundles_post_ra>
